<compile_context>
chip_gen: v6e
topology: v6e:2x2x1
jax: 0.10.0
libtpu: 0.0.40
codegen_flags: <defaults>
</compile_context>

<pallas_src>
import math
import functools

import jax
import jax.numpy as jnp
from jax.experimental import pallas as pl
from jax.experimental.pallas import tpu as pltpu

EPS = 1e-6            # LayerNorm eps (added to std, per the reference module)
NEG = -1e9            # masked_fill value


# ----------------------------- small helpers --------------------------------

@functools.lru_cache(maxsize=1)
def _vmem_limit():
    """Generation-aware scoped-VMEM limit (v5e/v6e ~102MB, v7x ~52MB)."""
    cap = 128 * 1024 * 1024
    try:
        cap = int(pltpu.get_tpu_info().vmem_capacity_bytes)
    except Exception:
        pass
    return min(int(cap * 0.8), 110 * 1024 * 1024)


# Probe single-buffering support for constant-index weight blocks.
try:
    _SINGLE_BUF = pl.Buffered(1)
    pl.BlockSpec((8, 128), lambda i: (0, 0), pipeline_mode=_SINGLE_BUF)
except Exception:                      # pragma: no cover - older API
    _SINGLE_BUF = None


def _const_spec(shape):
    """Constant-index (weight) block; single-buffered when supported."""
    n = len(shape)
    idx = lambda *_, n=n: (0,) * n
    if _SINGLE_BUF is not None:
        return pl.BlockSpec(shape, idx, pipeline_mode=_SINGLE_BUF)
    return pl.BlockSpec(shape, idx)


def _pick_tile(total, pref):
    """Largest multiple-of-128 tile <= pref dividing `total`, else `total`."""
    if total % 128 != 0:
        return total
    t = min(pref, total)
    t -= t % 128
    while total % t != 0:
        t -= 128
    return max(t, 128)


def _vocab_tile(vocab):
    # One full-width tile for small vocabs; 2048-wide tiles otherwise (weight
    # and bias are padded to a 2048 multiple so the tile never degenerates).
    return vocab if vocab <= 2048 else 2048


def _row_tile(n_rows, tv, budget_bytes):
    """Largest row chunk dividing n_rows whose (rows, tv) f32 tile fits budget."""
    tm = n_rows
    while tm * tv * 4 > budget_bytes and tm % 2 == 0 and (tm // 2) % 8 == 0:
        tm //= 2
    return tm


def _layernorm(v, g, b, feat):
    # Matches the reference LayerNorm exactly: torch.std is unbiased (N-1),
    # and eps is added to std (not var).
    mean = jnp.mean(v, axis=-1, keepdims=True)
    var = jnp.sum((v - mean) ** 2, axis=-1, keepdims=True) / (feat - 1)
    std = jnp.sqrt(var)
    return g * (v - mean) / (std + EPS) + b


def _gelu(x):
    # tanh-approximation GELU, as in the reference GELU module.
    return 0.5 * x * (1.0 + jnp.tanh(math.sqrt(2.0 / math.pi)
                                     * (x + 0.044715 * x ** 3)))


def _log_softmax(logits):
    m = jnp.max(logits, axis=-1, keepdims=True)
    lse = jnp.log(jnp.sum(jnp.exp(logits - m), axis=-1, keepdims=True)) + m
    return logits - lse


# --------------------------- transformer block -------------------------------

def transformer_block_kernel(n_heads, d_k, tq,
                             x_ref, mask_ref,
                             ln1g_ref, ln1b_ref,
                             wqkv_ref, bqkv_ref,
                             wo_ref, bo_ref,
                             ln2g_ref, ln2b_ref,
                             w1_ref, b1_ref, w2_ref, b2_ref,
                             o_ref,
                             q_scr, k_scr, v_scr, ctx_scr):
    qi = pl.program_id(1)              # query-tile index ("arbitrary" axis)
    H = o_ref.shape[-1]

    # ---- Q/K/V projection for the whole sequence: once per batch element ----
    @pl.when(qi == 0)
    def _project_qkv():
        x = x_ref[...].astype(jnp.float32)                  # (S, H)
        h = _layernorm(x, ln1g_ref[...], ln1b_ref[...], H)
        # one wide bf16 MXU pass; 1/sqrt(d_k) is already folded into Wq/bq
        qkv = (jnp.dot(h.astype(jnp.bfloat16), wqkv_ref[...],
                       preferred_element_type=jnp.float32)
               + bqkv_ref[...]).astype(jnp.bfloat16)        # (S, 3H), cast once
        # TODO(synk): pltpu.einshape('s(hd)->hsd') would replace these 64-lane
        # slice copies; kept as slice stores for Mosaic-lowering robustness.
        for hh in range(n_heads):
            a = hh * d_k
            q_scr[hh] = qkv[:, a:a + d_k]
            k_scr[hh] = qkv[:, H + a:H + a + d_k]
            v_scr[hh] = qkv[:, 2 * H + a:2 * H + a + d_k]

    # ---- attention + FFN for this query tile ----
    row0 = pl.multiple_of(qi * tq, tq)
    x_t = x_ref[pl.ds(row0, tq), :].astype(jnp.float32)     # (tq, H)
    q_h = q_scr[:, pl.ds(row0, tq), :]                      # (nh, tq, dk) bf16

    km = mask_ref[...]                                      # (1, S) key validity
    mask_add = jnp.where(km > 0, 0.0, NEG)                  # additive mask

    sc = jnp.einsum('hqd,hkd->hqk', q_h, k_scr[...],
                    preferred_element_type=jnp.float32)     # (nh, tq, S)
    sc = sc + mask_add

    m = jnp.max(sc, axis=-1, keepdims=True)
    # exp in bf16 (bf16 EUP on v6e/v7x); denominator accumulated in f32
    p = jnp.exp((sc - m).astype(jnp.bfloat16))
    l = jnp.sum(p, axis=-1, keepdims=True, dtype=jnp.float32)
    ctx = jnp.einsum('hqk,hkd->hqd', p, v_scr[...],
                     preferred_element_type=jnp.float32)    # (nh, tq, dk)
    ctx = (ctx * pl.reciprocal(l, approx=True)).astype(jnp.bfloat16)
    for hh in range(n_heads):
        ctx_scr[:, hh * d_k:(hh + 1) * d_k] = ctx[hh]

    attn = (jnp.dot(ctx_scr[...], wo_ref[...],
                    preferred_element_type=jnp.float32) + bo_ref[...])
    x1 = x_t + attn                      # dropout(p=0.1) is identity at inference
    h2 = _layernorm(x1, ln2g_ref[...], ln2b_ref[...], H)

    f = (jnp.dot(h2.astype(jnp.bfloat16), w1_ref[...],
                 preferred_element_type=jnp.float32) + b1_ref[...])
    f = _gelu(f)
    out = x1 + jnp.dot(f.astype(jnp.bfloat16), w2_ref[...],
                       preferred_element_type=jnp.float32) + b2_ref[...]
    o_ref[...] = out.astype(o_ref.dtype)


def run_block(x, key_mask, p, n_heads):
    B, S, H = x.shape
    d_ff = p["w1"].shape[1]
    d_k = H // n_heads
    tq = _pick_tile(S, 256)            # query tile (bounds score/prob temporaries)
    nq = S // tq
    vmem = _vmem_limit()

    # TODO(synk): for v7x with B==1, the query axis could be made "parallel"
    # (needs a separate K/V pass or per-tile K/V recompute) to use both cores.

    kernel = functools.partial(transformer_block_kernel, n_heads, d_k, tq)
    return pl.pallas_call(
        kernel,
        out_shape=jax.ShapeDtypeStruct((B, S, H), jnp.bfloat16),
        grid=(B, nq),
        in_specs=[
            pl.BlockSpec((None, S, H), lambda b, q: (b, 0, 0)),   # x (full seq)
            pl.BlockSpec((None, 1, S), lambda b, q: (b, 0, 0)),   # key mask
            _const_spec((1, H)), _const_spec((1, H)),             # ln1 gamma/beta
            _const_spec((H, 3 * H)), _const_spec((1, 3 * H)),     # Wqkv, bqkv
            _const_spec((H, H)), _const_spec((1, H)),             # Wo, bo
            _const_spec((1, H)), _const_spec((1, H)),             # ln2 gamma/beta
            _const_spec((H, d_ff)), _const_spec((1, d_ff)),       # W1, b1
            _const_spec((d_ff, H)), _const_spec((1, H)),          # W2, b2
        ],
        out_specs=pl.BlockSpec((None, tq, H), lambda b, q: (b, q, 0)),
        scratch_shapes=[
            pltpu.VMEM((n_heads, S, d_k), jnp.bfloat16),   # Q heads (all rows)
            pltpu.VMEM((n_heads, S, d_k), jnp.bfloat16),   # K heads
            pltpu.VMEM((n_heads, S, d_k), jnp.bfloat16),   # V heads
            pltpu.VMEM((tq, H), jnp.bfloat16),             # merged context tile
        ],
        compiler_params=pltpu.CompilerParams(
            dimension_semantics=("parallel", "arbitrary"),
            vmem_limit_bytes=vmem),
    )(x, key_mask,
      p["ln1_g"], p["ln1_b"], p["wqkv"], p["bqkv"], p["wo"], p["bo"],
      p["ln2_g"], p["ln2_b"], p["w1"], p["b1"], p["w2"], p["b2"])


# ------------------------------ output heads --------------------------------

def mlm_lse_kernel(n_chunks, tm, h_ref, w_ref, b_ref, lse_ref, m_scr, l_scr):
    """Pass 1: online log-sum-exp over vocab tiles (weight streamed once)."""
    j = pl.program_id(0)

    @pl.when(j == 0)
    def _init():
        m_scr[...] = jnp.full_like(m_scr, -jnp.inf)
        l_scr[...] = jnp.zeros_like(l_scr)

    w = w_ref[...]
    bias = b_ref[...]
    for i in range(n_chunks):          # static unroll; bounds the live logits tile
        rows = pl.ds(i * tm, tm)
        logits = (jnp.dot(h_ref[rows, :], w,
                          preferred_element_type=jnp.float32) + bias)
        m_prev = m_scr[rows, :]
        m_new = jnp.maximum(m_prev, jnp.max(logits, axis=-1, keepdims=True))
        l_scr[rows, :] = (l_scr[rows, :] * jnp.exp(m_prev - m_new)
                          + jnp.sum(jnp.exp(logits - m_new), axis=-1,
                                    keepdims=True))
        m_scr[rows, :] = m_new

    @pl.when(j == pl.num_programs(0) - 1)
    def _final():
        lse_ref[...] = m_scr[...] + jnp.log(l_scr[...])


def mlm_logprob_kernel(tm, h_ref, w_ref, b_ref, lse_ref, o_ref):
    """Pass 2: recompute the logits tile and write final (unpadded) log-probs."""
    mi = pl.program_id(1)
    rows = pl.ds(pl.multiple_of(mi * tm, tm), tm)
    logits = (jnp.dot(h_ref[rows, :], w_ref[...],
                      preferred_element_type=jnp.float32) + b_ref[...])
    o_ref[...] = logits - lse_ref[rows, :]


def run_mlm(h, w, b, vocab):
    B, S, H = h.shape
    M = B * S
    hflat = h.reshape(M, H)            # flatten: weight streamed once, not per-b
    Vp = w.shape[1]                    # tile-padded vocab
    TV = _vocab_tile(vocab)
    assert Vp % TV == 0
    nv = Vp // TV
    vmem = _vmem_limit()

    tm_lse = _row_tile(M, TV, 8 * 1024 * 1024)     # in-kernel logits chunk
    n_chunks = M // tm_lse
    tm_out = _row_tile(M, TV, 4 * 1024 * 1024)     # output block rows
    nm = M // tm_out

    lse = pl.pallas_call(
        functools.partial(mlm_lse_kernel, n_chunks, tm_lse),
        out_shape=jax.ShapeDtypeStruct((M, 1), jnp.float32),
        grid=(nv,),
        in_specs=[
            _const_spec((M, H)),                              # resident h
            pl.BlockSpec((H, TV), lambda j: (0, j)),          # W tile
            pl.BlockSpec((1, TV), lambda j: (0, j)),          # b tile
        ],
        out_specs=pl.BlockSpec((M, 1), lambda j: (0, 0)),
        scratch_shapes=[pltpu.VMEM((M, 1), jnp.float32),      # running max
                        pltpu.VMEM((M, 1), jnp.float32)],     # running sum
        compiler_params=pltpu.CompilerParams(
            dimension_semantics=("arbitrary",), vmem_limit_bytes=vmem),
    )(hflat, w, b)

    # Final log-probs are written directly to the unpadded (M, vocab) output;
    # writes past `vocab` in the last vocab tile (if any) are masked, so there
    # is no host-side slice of a padded tensor and no f32 logits round-trip.
    logp = pl.pallas_call(
        functools.partial(mlm_logprob_kernel, tm_out),
        out_shape=jax.ShapeDtypeStruct((M, vocab), jnp.float32),
        grid=(nv, nm),
        in_specs=[
            _const_spec((M, H)),                              # resident h
            pl.BlockSpec((H, TV), lambda j, m: (0, j)),       # W tile (outer only)
            pl.BlockSpec((1, TV), lambda j, m: (0, j)),       # b tile
            _const_spec((M, 1)),                              # resident lse
        ],
        out_specs=pl.BlockSpec((tm_out, TV), lambda j, m: (m, j)),
        compiler_params=pltpu.CompilerParams(
            dimension_semantics=("parallel", "parallel"), vmem_limit_bytes=vmem),
    )(hflat, w, b, lse)

    return logp.reshape(B, S, vocab)


def nsp_kernel(x0_ref, w_ref, b_ref, o_ref):
    logits = (jnp.dot(x0_ref[...], w_ref[...],
                      preferred_element_type=jnp.float32) + b_ref[...])
    o_ref[...] = _log_softmax(logits)


def run_nsp(h0, w, b):
    B, H = h0.shape
    return pl.pallas_call(
        nsp_kernel,
        out_shape=jax.ShapeDtypeStruct((B, 2), jnp.float32),
        grid=(1,),
        in_specs=[
            pl.BlockSpec((B, H), lambda i: (0, 0)),
            pl.BlockSpec((H, 2), lambda i: (0, 0)),
            pl.BlockSpec((1, 2), lambda i: (0, 0)),
        ],
        out_specs=pl.BlockSpec((B, 2), lambda i: (0, 0)),
        compiler_params=pltpu.CompilerParams(
            dimension_semantics=("arbitrary",),
            vmem_limit_bytes=_vmem_limit()),
    )(h0, w, b)


# ------------------------------ parameters ----------------------------------

def init_params(key, vocab, H, n_layers, n_heads, d_ff, max_len=512):
    ks = jax.random.split(key, 4 + n_layers)
    bf = jnp.bfloat16
    d_k = H // n_heads
    q_scale = 1.0 / math.sqrt(d_k)

    tok = jax.random.normal(ks[0], (vocab, H), jnp.float32) * 0.02
    tok = tok.at[0].set(0.0)                 # padding_idx=0
    seg = jax.random.normal(ks[1], (3, H), jnp.float32) * 0.02
    seg = seg.at[0].set(0.0)                 # padding_idx=0

    # sinusoidal positional embedding (fixed buffer)
    pos = jnp.arange(max_len, dtype=jnp.float32)[:, None]
    div = jnp.exp(jnp.arange(0, H, 2, dtype=jnp.float32)
                  * -(math.log(10000.0) / H))
    pe = jnp.zeros((max_len, H), jnp.float32)
    pe = pe.at[:, 0::2].set(jnp.sin(pos * div))
    pe = pe.at[:, 1::2].set(jnp.cos(pos * div))

    def layer_params(k):
        kk = jax.random.split(k, 8)
        s = 0.05
        wqkv = jax.random.normal(kk[0], (H, 3 * H), jnp.float32) * s
        bqkv = jax.random.normal(kk[1], (1, 3 * H), jnp.float32) * s
        # fold the 1/sqrt(d_k) attention scale into the Q projection (free)
        wqkv = wqkv.at[:, :H].multiply(q_scale)
        bqkv = bqkv.at[:, :H].multiply(q_scale)
        return dict(
            ln1_g=jnp.ones((1, H), jnp.float32),
            ln1_b=jnp.zeros((1, H), jnp.float32),
            wqkv=wqkv.astype(bf),
            bqkv=bqkv,
            wo=(jax.random.normal(kk[2], (H, H), jnp.float32) * s).astype(bf),
            bo=jax.random.normal(kk[3], (1, H), jnp.float32) * s,
            ln2_g=jnp.ones((1, H), jnp.float32),
            ln2_b=jnp.zeros((1, H), jnp.float32),
            w1=(jax.random.normal(kk[4], (H, d_ff), jnp.float32) * s).astype(bf),
            b1=jax.random.normal(kk[5], (1, d_ff), jnp.float32) * s,
            w2=(jax.random.normal(kk[6], (d_ff, H), jnp.float32) * s).astype(bf),
            b2=jax.random.normal(kk[7], (1, H), jnp.float32) * s,
        )

    layers = [layer_params(ks[4 + i]) for i in range(n_layers)]

    kn, km_ = jax.random.split(ks[2])
    nsp_w = (jax.random.normal(kn, (H, 2), jnp.float32) * 0.05).astype(bf)
    nsp_b = jnp.zeros((1, 2), jnp.float32)

    # MLM weight padded to a multiple of the vocab tile; padded columns get
    # bias -1e9 so they vanish from the log-sum-exp (and are never written to
    # the unpadded output).
    TV = _vocab_tile(vocab)
    Vp = ((vocab + TV - 1) // TV) * TV
    mlm_w = jax.random.normal(km_, (H, vocab), jnp.float32) * 0.05
    mlm_w = jnp.pad(mlm_w, ((0, 0), (0, Vp - vocab))).astype(bf)
    mlm_b = jnp.full((1, Vp), NEG, jnp.float32).at[:, :vocab].set(0.0)

    return dict(tok_emb=tok, seg_emb=seg, pe=pe, layers=layers,
                nsp_w=nsp_w, nsp_b=nsp_b, mlm_w=mlm_w, mlm_b=mlm_b)


# ------------------------------ forward pass ---------------------------------

def bertlm_forward(x, segment_label, params, n_heads):
    B, S = x.shape
    assert S <= params["pe"].shape[0], "sequence longer than positional buffer"

    # mask = (x > 0).unsqueeze(1).repeat(1,S,1).unsqueeze(1): key-validity
    # broadcast over query rows -> carried in the compact (B, 1, S) form.
    key_mask = (x > 0).astype(jnp.float32)[:, None, :]

    # BERTEmbedding: token + positional + segment (gathers are plain-JAX glue).
    # TODO(synk): nn.Dropout(p=0.1) layers are identity (inference semantics).
    h = (params["tok_emb"][x]
         + params["pe"][None, :S, :]
         + params["seg_emb"][segment_label]).astype(jnp.bfloat16)

    for lp in params["layers"]:
        h = run_block(h, key_mask, lp, n_heads)

    vocab = params["tok_emb"].shape[0]
    nsp = run_nsp(h[:, 0, :], params["nsp_w"], params["nsp_b"])        # (B, 2)
    mlm = run_mlm(h, params["mlm_w"], params["mlm_b"], vocab)          # (B, S, V)
    return nsp, mlm


# ---------------------------------- main -------------------------------------

if __name__ == "__main__":
    B, S, H = 2, 8, 32
    n_layers, n_heads = 2, 4
    vocab = 64
    d_ff = 4 * H

    key = jax.random.PRNGKey(0)
    kx, kseg, kp = jax.random.split(key, 3)
    x = jax.random.randint(kx, (B, S), 0, vocab, dtype=jnp.int32)
    segment_label = jax.random.randint(kseg, (B, S), 0, 3, dtype=jnp.int32)

    params = init_params(kp, vocab, H, n_layers, n_heads, d_ff)

    nsp_logp, mlm_logp = bertlm_forward(x, segment_label, params, n_heads)
    jax.block_until_ready((nsp_logp, mlm_logp))

    assert nsp_logp.shape == (B, 2)
    assert mlm_logp.shape == (B, S, vocab)
    assert bool(jnp.all(jnp.isfinite(nsp_logp)))
    assert bool(jnp.all(jnp.isfinite(mlm_logp)))
    print("KERNEL_OK")
</pallas_src>

<mosaic_0001>
module attributes {stable_mosaic.version = 11 : i64} {
  func.func @transformer_block_kernel(%arg0: i32, %arg1: i32, %arg2: memref<1x8x32xbf16, #tpu.memory_space<vmem>>, %arg3: memref<1x1x8xf32, #tpu.memory_space<vmem>>, %arg4: memref<1x32xf32, #tpu.memory_space<vmem>>, %arg5: memref<1x32xf32, #tpu.memory_space<vmem>>, %arg6: memref<32x96xbf16, #tpu.memory_space<vmem>>, %arg7: memref<1x96xf32, #tpu.memory_space<vmem>>, %arg8: memref<32x32xbf16, #tpu.memory_space<vmem>>, %arg9: memref<1x32xf32, #tpu.memory_space<vmem>>, %arg10: memref<1x32xf32, #tpu.memory_space<vmem>>, %arg11: memref<1x32xf32, #tpu.memory_space<vmem>>, %arg12: memref<32x128xbf16, #tpu.memory_space<vmem>>, %arg13: memref<1x128xf32, #tpu.memory_space<vmem>>, %arg14: memref<128x32xbf16, #tpu.memory_space<vmem>>, %arg15: memref<1x32xf32, #tpu.memory_space<vmem>>, %arg16: memref<1x8x32xbf16, #tpu.memory_space<vmem>>, %arg17: memref<4x8x8xbf16, #tpu.memory_space<vmem>>, %arg18: memref<4x8x8xbf16, #tpu.memory_space<vmem>>, %arg19: memref<4x8x8xbf16, #tpu.memory_space<vmem>>, %arg20: memref<8x32xbf16, #tpu.memory_space<vmem>>) attributes {dimension_semantics = [#tpu.dimension_semantics<parallel>, #tpu.dimension_semantics<arbitrary>], iteration_bounds = array<i64: 2, 1>, scalar_prefetch = 0 : i64, scratch_operands = 4 : i64, tpu.core_type = #tpu.core_type<tc>, window_params = [{transform_indices = @transform_0, window_bounds = array<i64: 1, 8, 32>}, {transform_indices = @transform_1, window_bounds = array<i64: 1, 1, 8>}, {pipeline_mode = #tpu.pipeline_mode<synchronous>, transform_indices = @transform_2, window_bounds = array<i64: 1, 32>}, {pipeline_mode = #tpu.pipeline_mode<synchronous>, transform_indices = @transform_3, window_bounds = array<i64: 1, 32>}, {pipeline_mode = #tpu.pipeline_mode<synchronous>, transform_indices = @transform_4, window_bounds = array<i64: 32, 96>}, {pipeline_mode = #tpu.pipeline_mode<synchronous>, transform_indices = @transform_5, window_bounds = array<i64: 1, 96>}, {pipeline_mode = #tpu.pipeline_mode<synchronous>, transform_indices = @transform_6, window_bounds = array<i64: 32, 32>}, {pipeline_mode = #tpu.pipeline_mode<synchronous>, transform_indices = @transform_7, window_bounds = array<i64: 1, 32>}, {pipeline_mode = #tpu.pipeline_mode<synchronous>, transform_indices = @transform_8, window_bounds = array<i64: 1, 32>}, {pipeline_mode = #tpu.pipeline_mode<synchronous>, transform_indices = @transform_9, window_bounds = array<i64: 1, 32>}, {pipeline_mode = #tpu.pipeline_mode<synchronous>, transform_indices = @transform_10, window_bounds = array<i64: 32, 128>}, {pipeline_mode = #tpu.pipeline_mode<synchronous>, transform_indices = @transform_11, window_bounds = array<i64: 1, 128>}, {pipeline_mode = #tpu.pipeline_mode<synchronous>, transform_indices = @transform_12, window_bounds = array<i64: 128, 32>}, {pipeline_mode = #tpu.pipeline_mode<synchronous>, transform_indices = @transform_13, window_bounds = array<i64: 1, 32>}, {transform_indices = @transform_14, window_bounds = array<i64: 1, 8, 32>}]} {
    %c0_i32 = arith.constant 0 : i32
    %0 = arith.cmpi eq, %arg1, %c0_i32 : i32
    %1 = arith.extui %0 : i1 to i32
    %c0_i32_0 = arith.constant 0 : i32
    %2 = arith.cmpi ne, %1, %c0_i32_0 : i32
    scf.if %2 {
      %c0_57 = arith.constant 0 : index
      %c0_58 = arith.constant 0 : index
      %c0_59 = arith.constant 0 : index
      %111 = vector.load %arg2[%c0_57, %c0_58, %c0_59] : memref<1x8x32xbf16, #tpu.memory_space<vmem>>, vector<1x8x32xbf16>
      %112 = vector.shape_cast %111 : vector<1x8x32xbf16> to vector<8x32xbf16>
      %113 = arith.extf %112 : vector<8x32xbf16> to vector<8x32xf32>
      %c0_60 = arith.constant 0 : index
      %c0_61 = arith.constant 0 : index
      %114 = vector.load %arg4[%c0_60, %c0_61] : memref<1x32xf32, #tpu.memory_space<vmem>>, vector<1x32xf32>
      %c0_62 = arith.constant 0 : index
      %c0_63 = arith.constant 0 : index
      %115 = vector.load %arg5[%c0_62, %c0_63] : memref<1x32xf32, #tpu.memory_space<vmem>>, vector<1x32xf32>
      %cst_64 = arith.constant dense<0.000000e+00> : vector<8xf32>
      %116 = vector.multi_reduction <add>, %113, %cst_64 [1] : vector<8x32xf32> to vector<8xf32>
      %117 = vector.shape_cast %116 : vector<8xf32> to vector<8x1xf32>
      %cst_65 = arith.constant 3.200000e+01 : f32
      %118 = vector.broadcast %cst_65 : f32 to vector<8x1xf32>
      %119 = arith.divf %117, %118 : vector<8x1xf32>
      %120 = vector.broadcast %119 : vector<8x1xf32> to vector<8x32xf32>
      %121 = arith.subf %113, %120 : vector<8x32xf32>
      %122 = arith.mulf %121, %121 : vector<8x32xf32>
      %cst_66 = arith.constant dense<0.000000e+00> : vector<8xf32>
      %123 = vector.multi_reduction <add>, %122, %cst_66 [1] : vector<8x32xf32> to vector<8xf32>
      %124 = vector.shape_cast %123 : vector<8xf32> to vector<8x1xf32>
      %cst_67 = arith.constant 3.100000e+01 : f32
      %125 = vector.broadcast %cst_67 : f32 to vector<8x1xf32>
      %126 = arith.divf %124, %125 : vector<8x1xf32>
      %127 = math.sqrt %126 : vector<8x1xf32>
      %128 = vector.broadcast %119 : vector<8x1xf32> to vector<8x32xf32>
      %129 = arith.subf %113, %128 : vector<8x32xf32>
      %130 = vector.broadcast %114 : vector<1x32xf32> to vector<8x32xf32>
      %131 = arith.mulf %130, %129 : vector<8x32xf32>
      %cst_68 = arith.constant 9.99999997E-7 : f32
      %132 = vector.broadcast %cst_68 : f32 to vector<8x1xf32>
      %133 = arith.addf %127, %132 : vector<8x1xf32>
      %134 = vector.broadcast %133 : vector<8x1xf32> to vector<8x32xf32>
      %135 = arith.divf %131, %134 : vector<8x32xf32>
      %136 = vector.broadcast %115 : vector<1x32xf32> to vector<8x32xf32>
      %137 = arith.addf %135, %136 : vector<8x32xf32>
      %138 = arith.truncf %137 : vector<8x32xf32> to vector<8x32xbf16>
      %c0_69 = arith.constant 0 : index
      %c0_70 = arith.constant 0 : index
      %139 = vector.load %arg6[%c0_69, %c0_70] : memref<32x96xbf16, #tpu.memory_space<vmem>>, vector<32x96xbf16>
      %cst_71 = arith.constant dense<0.000000e+00> : vector<8x96xf32>
      %140 = tpu.matmul %138, %139, %cst_71 {dimension_numbers = #tpu.dot_dimension_numbers<[1], [0], [0], [1], [0, 0, 1, 1], [], []>} : vector<8x32xbf16>, vector<32x96xbf16>, vector<8x96xf32> -> vector<8x96xf32>
      %c0_72 = arith.constant 0 : index
      %c0_73 = arith.constant 0 : index
      %141 = vector.load %arg7[%c0_72, %c0_73] : memref<1x96xf32, #tpu.memory_space<vmem>>, vector<1x96xf32>
      %142 = vector.broadcast %141 : vector<1x96xf32> to vector<8x96xf32>
      %143 = arith.addf %140, %142 : vector<8x96xf32>
      %144 = arith.truncf %143 : vector<8x96xf32> to vector<8x96xbf16>
      %145 = vector.extract_strided_slice %144 {offsets = [0, 0], sizes = [8, 8], strides = [1, 1]} : vector<8x96xbf16> to vector<8x8xbf16>
      %c0_74 = arith.constant 0 : index
      %c0_75 = arith.constant 0 : index
      %c0_76 = arith.constant 0 : index
      %146 = vector.load %arg17[%c0_74, %c0_75, %c0_76] : memref<4x8x8xbf16, #tpu.memory_space<vmem>>, vector<1x8x8xbf16>
      %147 = vector.shape_cast %146 : vector<1x8x8xbf16> to vector<8x8xbf16>
      %148 = vector.shape_cast %145 : vector<8x8xbf16> to vector<1x8x8xbf16>
      tpu.vector_store %arg17[%c0_74, %c0_75, %c0_76], %148 {strides = array<i32>} : memref<4x8x8xbf16, #tpu.memory_space<vmem>>, vector<1x8x8xbf16>,
      %149 = vector.extract_strided_slice %144 {offsets = [0, 32], sizes = [8, 8], strides = [1, 1]} : vector<8x96xbf16> to vector<8x8xbf16>
      %c0_77 = arith.constant 0 : index
      %c0_78 = arith.constant 0 : index
      %c0_79 = arith.constant 0 : index
      %150 = vector.load %arg18[%c0_77, %c0_78, %c0_79] : memref<4x8x8xbf16, #tpu.memory_space<vmem>>, vector<1x8x8xbf16>
      %151 = vector.shape_cast %150 : vector<1x8x8xbf16> to vector<8x8xbf16>
      %152 = vector.shape_cast %149 : vector<8x8xbf16> to vector<1x8x8xbf16>
      tpu.vector_store %arg18[%c0_77, %c0_78, %c0_79], %152 {strides = array<i32>} : memref<4x8x8xbf16, #tpu.memory_space<vmem>>, vector<1x8x8xbf16>,
      %153 = vector.extract_strided_slice %144 {offsets = [0, 64], sizes = [8, 8], strides = [1, 1]} : vector<8x96xbf16> to vector<8x8xbf16>
      %c0_80 = arith.constant 0 : index
      %c0_81 = arith.constant 0 : index
      %c0_82 = arith.constant 0 : index
      %154 = vector.load %arg19[%c0_80, %c0_81, %c0_82] : memref<4x8x8xbf16, #tpu.memory_space<vmem>>, vector<1x8x8xbf16>
      %155 = vector.shape_cast %154 : vector<1x8x8xbf16> to vector<8x8xbf16>
      %156 = vector.shape_cast %153 : vector<8x8xbf16> to vector<1x8x8xbf16>
      tpu.vector_store %arg19[%c0_80, %c0_81, %c0_82], %156 {strides = array<i32>} : memref<4x8x8xbf16, #tpu.memory_space<vmem>>, vector<1x8x8xbf16>,
      %157 = vector.extract_strided_slice %144 {offsets = [0, 8], sizes = [8, 8], strides = [1, 1]} : vector<8x96xbf16> to vector<8x8xbf16>
      %c1 = arith.constant 1 : index
      %c0_83 = arith.constant 0 : index
      %c0_84 = arith.constant 0 : index
      %158 = vector.load %arg17[%c1, %c0_83, %c0_84] : memref<4x8x8xbf16, #tpu.memory_space<vmem>>, vector<1x8x8xbf16>
      %159 = vector.shape_cast %158 : vector<1x8x8xbf16> to vector<8x8xbf16>
      %160 = vector.shape_cast %157 : vector<8x8xbf16> to vector<1x8x8xbf16>
      tpu.vector_store %arg17[%c1, %c0_83, %c0_84], %160 {strides = array<i32>} : memref<4x8x8xbf16, #tpu.memory_space<vmem>>, vector<1x8x8xbf16>,
      %161 = vector.extract_strided_slice %144 {offsets = [0, 40], sizes = [8, 8], strides = [1, 1]} : vector<8x96xbf16> to vector<8x8xbf16>
      %c1_85 = arith.constant 1 : index
      %c0_86 = arith.constant 0 : index
      %c0_87 = arith.constant 0 : index
      %162 = vector.load %arg18[%c1_85, %c0_86, %c0_87] : memref<4x8x8xbf16, #tpu.memory_space<vmem>>, vector<1x8x8xbf16>
      %163 = vector.shape_cast %162 : vector<1x8x8xbf16> to vector<8x8xbf16>
      %164 = vector.shape_cast %161 : vector<8x8xbf16> to vector<1x8x8xbf16>
      tpu.vector_store %arg18[%c1_85, %c0_86, %c0_87], %164 {strides = array<i32>} : memref<4x8x8xbf16, #tpu.memory_space<vmem>>, vector<1x8x8xbf16>,
      %165 = vector.extract_strided_slice %144 {offsets = [0, 72], sizes = [8, 8], strides = [1, 1]} : vector<8x96xbf16> to vector<8x8xbf16>
      %c1_88 = arith.constant 1 : index
      %c0_89 = arith.constant 0 : index
      %c0_90 = arith.constant 0 : index
      %166 = vector.load %arg19[%c1_88, %c0_89, %c0_90] : memref<4x8x8xbf16, #tpu.memory_space<vmem>>, vector<1x8x8xbf16>
      %167 = vector.shape_cast %166 : vector<1x8x8xbf16> to vector<8x8xbf16>
      %168 = vector.shape_cast %165 : vector<8x8xbf16> to vector<1x8x8xbf16>
      tpu.vector_store %arg19[%c1_88, %c0_89, %c0_90], %168 {strides = array<i32>} : memref<4x8x8xbf16, #tpu.memory_space<vmem>>, vector<1x8x8xbf16>,
      %169 = vector.extract_strided_slice %144 {offsets = [0, 16], sizes = [8, 8], strides = [1, 1]} : vector<8x96xbf16> to vector<8x8xbf16>
      %c2 = arith.constant 2 : index
      %c0_91 = arith.constant 0 : index
      %c0_92 = arith.constant 0 : index
      %170 = vector.load %arg17[%c2, %c0_91, %c0_92] : memref<4x8x8xbf16, #tpu.memory_space<vmem>>, vector<1x8x8xbf16>
      %171 = vector.shape_cast %170 : vector<1x8x8xbf16> to vector<8x8xbf16>
      %172 = vector.shape_cast %169 : vector<8x8xbf16> to vector<1x8x8xbf16>
      tpu.vector_store %arg17[%c2, %c0_91, %c0_92], %172 {strides = array<i32>} : memref<4x8x8xbf16, #tpu.memory_space<vmem>>, vector<1x8x8xbf16>,
      %173 = vector.extract_strided_slice %144 {offsets = [0, 48], sizes = [8, 8], strides = [1, 1]} : vector<8x96xbf16> to vector<8x8xbf16>
      %c2_93 = arith.constant 2 : index
      %c0_94 = arith.constant 0 : index
      %c0_95 = arith.constant 0 : index
      %174 = vector.load %arg18[%c2_93, %c0_94, %c0_95] : memref<4x8x8xbf16, #tpu.memory_space<vmem>>, vector<1x8x8xbf16>
      %175 = vector.shape_cast %174 : vector<1x8x8xbf16> to vector<8x8xbf16>
      %176 = vector.shape_cast %173 : vector<8x8xbf16> to vector<1x8x8xbf16>
      tpu.vector_store %arg18[%c2_93, %c0_94, %c0_95], %176 {strides = array<i32>} : memref<4x8x8xbf16, #tpu.memory_space<vmem>>, vector<1x8x8xbf16>,
      %177 = vector.extract_strided_slice %144 {offsets = [0, 80], sizes = [8, 8], strides = [1, 1]} : vector<8x96xbf16> to vector<8x8xbf16>
      %c2_96 = arith.constant 2 : index
      %c0_97 = arith.constant 0 : index
      %c0_98 = arith.constant 0 : index
      %178 = vector.load %arg19[%c2_96, %c0_97, %c0_98] : memref<4x8x8xbf16, #tpu.memory_space<vmem>>, vector<1x8x8xbf16>
      %179 = vector.shape_cast %178 : vector<1x8x8xbf16> to vector<8x8xbf16>
      %180 = vector.shape_cast %177 : vector<8x8xbf16> to vector<1x8x8xbf16>
      tpu.vector_store %arg19[%c2_96, %c0_97, %c0_98], %180 {strides = array<i32>} : memref<4x8x8xbf16, #tpu.memory_space<vmem>>, vector<1x8x8xbf16>,
      %181 = vector.extract_strided_slice %144 {offsets = [0, 24], sizes = [8, 8], strides = [1, 1]} : vector<8x96xbf16> to vector<8x8xbf16>
      %c3 = arith.constant 3 : index
      %c0_99 = arith.constant 0 : index
      %c0_100 = arith.constant 0 : index
      %182 = vector.load %arg17[%c3, %c0_99, %c0_100] : memref<4x8x8xbf16, #tpu.memory_space<vmem>>, vector<1x8x8xbf16>
      %183 = vector.shape_cast %182 : vector<1x8x8xbf16> to vector<8x8xbf16>
      %184 = vector.shape_cast %181 : vector<8x8xbf16> to vector<1x8x8xbf16>
      tpu.vector_store %arg17[%c3, %c0_99, %c0_100], %184 {strides = array<i32>} : memref<4x8x8xbf16, #tpu.memory_space<vmem>>, vector<1x8x8xbf16>,
      %185 = vector.extract_strided_slice %144 {offsets = [0, 56], sizes = [8, 8], strides = [1, 1]} : vector<8x96xbf16> to vector<8x8xbf16>
      %c3_101 = arith.constant 3 : index
      %c0_102 = arith.constant 0 : index
      %c0_103 = arith.constant 0 : index
      %186 = vector.load %arg18[%c3_101, %c0_102, %c0_103] : memref<4x8x8xbf16, #tpu.memory_space<vmem>>, vector<1x8x8xbf16>
      %187 = vector.shape_cast %186 : vector<1x8x8xbf16> to vector<8x8xbf16>
      %188 = vector.shape_cast %185 : vector<8x8xbf16> to vector<1x8x8xbf16>
      tpu.vector_store %arg18[%c3_101, %c0_102, %c0_103], %188 {strides = array<i32>} : memref<4x8x8xbf16, #tpu.memory_space<vmem>>, vector<1x8x8xbf16>,
      %189 = vector.extract_strided_slice %144 {offsets = [0, 88], sizes = [8, 8], strides = [1, 1]} : vector<8x96xbf16> to vector<8x8xbf16>
      %c3_104 = arith.constant 3 : index
      %c0_105 = arith.constant 0 : index
      %c0_106 = arith.constant 0 : index
      %190 = vector.load %arg19[%c3_104, %c0_105, %c0_106] : memref<4x8x8xbf16, #tpu.memory_space<vmem>>, vector<1x8x8xbf16>
      %191 = vector.shape_cast %190 : vector<1x8x8xbf16> to vector<8x8xbf16>
      %192 = vector.shape_cast %189 : vector<8x8xbf16> to vector<1x8x8xbf16>
      tpu.vector_store %arg19[%c3_104, %c0_105, %c0_106], %192 {strides = array<i32>} : memref<4x8x8xbf16, #tpu.memory_space<vmem>>, vector<1x8x8xbf16>,
    } else {
    }
    %c8_i32 = arith.constant 8 : i32
    %3 = arith.muli %arg1, %c8_i32 : i32
    %4 = tpu.assume_multiple %3, 8 : i32
    %c0 = arith.constant 0 : index
    %5 = arith.index_cast %4 : i32 to index
    %c0_1 = arith.constant 0 : index
    %6 = vector.load %arg2[%c0, %5, %c0_1] : memref<1x8x32xbf16, #tpu.memory_space<vmem>>, vector<1x8x32xbf16>
    %7 = vector.shape_cast %6 : vector<1x8x32xbf16> to vector<8x32xbf16>
    %8 = arith.extf %7 : vector<8x32xbf16> to vector<8x32xf32>
    %c0_2 = arith.constant 0 : index
    %9 = arith.index_cast %4 : i32 to index
    %c0_3 = arith.constant 0 : index
    %10 = vector.load %arg17[%c0_2, %9, %c0_3] : memref<4x8x8xbf16, #tpu.memory_space<vmem>>, vector<4x8x8xbf16>
    %c0_4 = arith.constant 0 : index
    %c0_5 = arith.constant 0 : index
    %c0_6 = arith.constant 0 : index
    %11 = vector.load %arg3[%c0_4, %c0_5, %c0_6] : memref<1x1x8xf32, #tpu.memory_space<vmem>>, vector<1x1x8xf32>
    %12 = vector.shape_cast %11 : vector<1x1x8xf32> to vector<1x8xf32>
    %cst = arith.constant 0.000000e+00 : f32
    %13 = vector.broadcast %cst : f32 to vector<1x8xf32>
    %14 = arith.cmpf ogt, %12, %13 : vector<1x8xf32>
    %cst_7 = arith.constant 0.000000e+00 : f32
    %cst_8 = arith.constant -1.000000e+09 : f32
    %15 = vector.broadcast %cst_7 : f32 to vector<1x8xf32>
    %16 = vector.broadcast %cst_8 : f32 to vector<1x8xf32>
    %17 = arith.select %14, %15, %16 : vector<1x8xi1>, vector<1x8xf32>
    %c0_9 = arith.constant 0 : index
    %c0_10 = arith.constant 0 : index
    %c0_11 = arith.constant 0 : index
    %18 = vector.load %arg18[%c0_9, %c0_10, %c0_11] : memref<4x8x8xbf16, #tpu.memory_space<vmem>>, vector<4x8x8xbf16>
    "tpu.trace_start"() <{level = 10 : i32, message = "hqd,hkd->hqk"}> : () -> ()
    %cst_12 = arith.constant dense<0.000000e+00> : vector<4x8x8xf32>
    %19 = tpu.matmul %10, %18, %cst_12 {dimension_numbers = #tpu.dot_dimension_numbers<[2], [2], [1], [1], [0, 0, 0, 1, 1, 1], [0], [0]>} : vector<4x8x8xbf16>, vector<4x8x8xbf16>, vector<4x8x8xf32> -> vector<4x8x8xf32>
    "tpu.trace_stop"() : () -> ()
    %20 = vector.shape_cast %17 : vector<1x8xf32> to vector<1x1x8xf32>
    %21 = vector.broadcast %20 : vector<1x1x8xf32> to vector<4x8x8xf32>
    %22 = arith.addf %19, %21 : vector<4x8x8xf32>
    %cst_13 = arith.constant dense<0xFF800000> : vector<4x8xf32>
    %23 = vector.multi_reduction <maximumf>, %22, %cst_13 [2] : vector<4x8x8xf32> to vector<4x8xf32>
    %24 = vector.shape_cast %23 : vector<4x8xf32> to vector<4x8x1xf32>
    %25 = vector.broadcast %24 : vector<4x8x1xf32> to vector<4x8x8xf32>
    %26 = arith.subf %22, %25 : vector<4x8x8xf32>
    %27 = arith.truncf %26 : vector<4x8x8xf32> to vector<4x8x8xbf16>
    %28 = math.exp %27 : vector<4x8x8xbf16>
    %29 = arith.extf %28 : vector<4x8x8xbf16> to vector<4x8x8xf32>
    %cst_14 = arith.constant dense<0.000000e+00> : vector<4x8xf32>
    %30 = vector.multi_reduction <add>, %29, %cst_14 [2] : vector<4x8x8xf32> to vector<4x8xf32>
    %31 = vector.shape_cast %30 : vector<4x8xf32> to vector<4x8x1xf32>
    %c0_15 = arith.constant 0 : index
    %c0_16 = arith.constant 0 : index
    %c0_17 = arith.constant 0 : index
    %32 = vector.load %arg19[%c0_15, %c0_16, %c0_17] : memref<4x8x8xbf16, #tpu.memory_space<vmem>>, vector<4x8x8xbf16>
    "tpu.trace_start"() <{level = 10 : i32, message = "hqk,hkd->hqd"}> : () -> ()
    %cst_18 = arith.constant dense<0.000000e+00> : vector<4x8x8xf32>
    %33 = tpu.matmul %28, %32, %cst_18 {dimension_numbers = #tpu.dot_dimension_numbers<[2], [1], [1], [2], [0, 0, 0, 1, 1, 2], [0], [0]>} : vector<4x8x8xbf16>, vector<4x8x8xbf16>, vector<4x8x8xf32> -> vector<4x8x8xf32>
    "tpu.trace_stop"() : () -> ()
    %34 = tpu.reciprocal %31 {approx = true} : vector<4x8x1xf32> -> vector<4x8x1xf32>
    %35 = vector.broadcast %34 : vector<4x8x1xf32> to vector<4x8x8xf32>
    %36 = arith.mulf %33, %35 : vector<4x8x8xf32>
    %37 = arith.truncf %36 : vector<4x8x8xf32> to vector<4x8x8xbf16>
    %38 = vector.extract_strided_slice %37 {offsets = [0, 0, 0], sizes = [1, 8, 8], strides = [1, 1, 1]} : vector<4x8x8xbf16> to vector<1x8x8xbf16>
    %39 = vector.shape_cast %38 : vector<1x8x8xbf16> to vector<8x8xbf16>
    %c0_19 = arith.constant 0 : index
    %c0_20 = arith.constant 0 : index
    %40 = vector.load %arg20[%c0_19, %c0_20] : memref<8x32xbf16, #tpu.memory_space<vmem>>, vector<8x8xbf16>
    tpu.vector_store %arg20[%c0_19, %c0_20], %39 {strides = array<i32>} : memref<8x32xbf16, #tpu.memory_space<vmem>>, vector<8x8xbf16>,
    %41 = vector.extract_strided_slice %37 {offsets = [1, 0, 0], sizes = [1, 8, 8], strides = [1, 1, 1]} : vector<4x8x8xbf16> to vector<1x8x8xbf16>
    %42 = vector.shape_cast %41 : vector<1x8x8xbf16> to vector<8x8xbf16>
    %c0_21 = arith.constant 0 : index
    %c8 = arith.constant 8 : index
    %43 = vector.load %arg20[%c0_21, %c8] : memref<8x32xbf16, #tpu.memory_space<vmem>>, vector<8x8xbf16>
    tpu.vector_store %arg20[%c0_21, %c8], %42 {strides = array<i32>} : memref<8x32xbf16, #tpu.memory_space<vmem>>, vector<8x8xbf16>,
    %44 = vector.extract_strided_slice %37 {offsets = [2, 0, 0], sizes = [1, 8, 8], strides = [1, 1, 1]} : vector<4x8x8xbf16> to vector<1x8x8xbf16>
    %45 = vector.shape_cast %44 : vector<1x8x8xbf16> to vector<8x8xbf16>
    %c0_22 = arith.constant 0 : index
    %c16 = arith.constant 16 : index
    %46 = vector.load %arg20[%c0_22, %c16] : memref<8x32xbf16, #tpu.memory_space<vmem>>, vector<8x8xbf16>
    tpu.vector_store %arg20[%c0_22, %c16], %45 {strides = array<i32>} : memref<8x32xbf16, #tpu.memory_space<vmem>>, vector<8x8xbf16>,
    %47 = vector.extract_strided_slice %37 {offsets = [3, 0, 0], sizes = [1, 8, 8], strides = [1, 1, 1]} : vector<4x8x8xbf16> to vector<1x8x8xbf16>
    %48 = vector.shape_cast %47 : vector<1x8x8xbf16> to vector<8x8xbf16>
    %c0_23 = arith.constant 0 : index
    %c24 = arith.constant 24 : index
    %49 = vector.load %arg20[%c0_23, %c24] : memref<8x32xbf16, #tpu.memory_space<vmem>>, vector<8x8xbf16>
    tpu.vector_store %arg20[%c0_23, %c24], %48 {strides = array<i32>} : memref<8x32xbf16, #tpu.memory_space<vmem>>, vector<8x8xbf16>,
    %c0_24 = arith.constant 0 : index
    %c0_25 = arith.constant 0 : index
    %50 = vector.load %arg20[%c0_24, %c0_25] : memref<8x32xbf16, #tpu.memory_space<vmem>>, vector<8x32xbf16>
    %c0_26 = arith.constant 0 : index
    %c0_27 = arith.constant 0 : index
    %51 = vector.load %arg8[%c0_26, %c0_27] : memref<32x32xbf16, #tpu.memory_space<vmem>>, vector<32x32xbf16>
    %cst_28 = arith.constant dense<0.000000e+00> : vector<8x32xf32>
    %52 = tpu.matmul %50, %51, %cst_28 {dimension_numbers = #tpu.dot_dimension_numbers<[1], [0], [0], [1], [0, 0, 1, 1], [], []>} : vector<8x32xbf16>, vector<32x32xbf16>, vector<8x32xf32> -> vector<8x32xf32>
    %c0_29 = arith.constant 0 : index
    %c0_30 = arith.constant 0 : index
    %53 = vector.load %arg9[%c0_29, %c0_30] : memref<1x32xf32, #tpu.memory_space<vmem>>, vector<1x32xf32>
    %54 = vector.broadcast %53 : vector<1x32xf32> to vector<8x32xf32>
    %55 = arith.addf %52, %54 : vector<8x32xf32>
    %56 = arith.addf %8, %55 : vector<8x32xf32>
    %c0_31 = arith.constant 0 : index
    %c0_32 = arith.constant 0 : index
    %57 = vector.load %arg10[%c0_31, %c0_32] : memref<1x32xf32, #tpu.memory_space<vmem>>, vector<1x32xf32>
    %c0_33 = arith.constant 0 : index
    %c0_34 = arith.constant 0 : index
    %58 = vector.load %arg11[%c0_33, %c0_34] : memref<1x32xf32, #tpu.memory_space<vmem>>, vector<1x32xf32>
    %cst_35 = arith.constant dense<0.000000e+00> : vector<8xf32>
    %59 = vector.multi_reduction <add>, %56, %cst_35 [1] : vector<8x32xf32> to vector<8xf32>
    %60 = vector.shape_cast %59 : vector<8xf32> to vector<8x1xf32>
    %cst_36 = arith.constant 3.200000e+01 : f32
    %61 = vector.broadcast %cst_36 : f32 to vector<8x1xf32>
    %62 = arith.divf %60, %61 : vector<8x1xf32>
    %63 = vector.broadcast %62 : vector<8x1xf32> to vector<8x32xf32>
    %64 = arith.subf %56, %63 : vector<8x32xf32>
    %65 = arith.mulf %64, %64 : vector<8x32xf32>
    %cst_37 = arith.constant dense<0.000000e+00> : vector<8xf32>
    %66 = vector.multi_reduction <add>, %65, %cst_37 [1] : vector<8x32xf32> to vector<8xf32>
    %67 = vector.shape_cast %66 : vector<8xf32> to vector<8x1xf32>
    %cst_38 = arith.constant 3.100000e+01 : f32
    %68 = vector.broadcast %cst_38 : f32 to vector<8x1xf32>
    %69 = arith.divf %67, %68 : vector<8x1xf32>
    %70 = math.sqrt %69 : vector<8x1xf32>
    %71 = vector.broadcast %62 : vector<8x1xf32> to vector<8x32xf32>
    %72 = arith.subf %56, %71 : vector<8x32xf32>
    %73 = vector.broadcast %57 : vector<1x32xf32> to vector<8x32xf32>
    %74 = arith.mulf %73, %72 : vector<8x32xf32>
    %cst_39 = arith.constant 9.99999997E-7 : f32
    %75 = vector.broadcast %cst_39 : f32 to vector<8x1xf32>
    %76 = arith.addf %70, %75 : vector<8x1xf32>
    %77 = vector.broadcast %76 : vector<8x1xf32> to vector<8x32xf32>
    %78 = arith.divf %74, %77 : vector<8x32xf32>
    %79 = vector.broadcast %58 : vector<1x32xf32> to vector<8x32xf32>
    %80 = arith.addf %78, %79 : vector<8x32xf32>
    %81 = arith.truncf %80 : vector<8x32xf32> to vector<8x32xbf16>
    %c0_40 = arith.constant 0 : index
    %c0_41 = arith.constant 0 : index
    %82 = vector.load %arg12[%c0_40, %c0_41] : memref<32x128xbf16, #tpu.memory_space<vmem>>, vector<32x128xbf16>
    %cst_42 = arith.constant dense<0.000000e+00> : vector<8x128xf32>
    %83 = tpu.matmul %81, %82, %cst_42 {dimension_numbers = #tpu.dot_dimension_numbers<[1], [0], [0], [1], [0, 0, 1, 1], [], []>} : vector<8x32xbf16>, vector<32x128xbf16>, vector<8x128xf32> -> vector<8x128xf32>
    %c0_43 = arith.constant 0 : index
    %c0_44 = arith.constant 0 : index
    %84 = vector.load %arg13[%c0_43, %c0_44] : memref<1x128xf32, #tpu.memory_space<vmem>>, vector<1x128xf32>
    %85 = vector.broadcast %84 : vector<1x128xf32> to vector<8x128xf32>
    %86 = arith.addf %83, %85 : vector<8x128xf32>
    %cst_45 = arith.constant 5.000000e-01 : f32
    %87 = vector.broadcast %cst_45 : f32 to vector<8x128xf32>
    %88 = arith.mulf %87, %86 : vector<8x128xf32>
    %89 = arith.mulf %86, %86 : vector<8x128xf32>
    %90 = arith.mulf %86, %89 : vector<8x128xf32>
    %cst_46 = arith.constant 4.471500e-02 : f32
    %91 = vector.broadcast %cst_46 : f32 to vector<8x128xf32>
    %92 = arith.mulf %91, %90 : vector<8x128xf32>
    %93 = arith.addf %86, %92 : vector<8x128xf32>
    %cst_47 = arith.constant 0.797884583 : f32
    %94 = vector.broadcast %cst_47 : f32 to vector<8x128xf32>
    %95 = arith.mulf %94, %93 : vector<8x128xf32>
    %96 = math.tanh %95 : vector<8x128xf32>
    %cst_48 = arith.constant 1.000000e+00 : f32
    %97 = vector.broadcast %cst_48 : f32 to vector<8x128xf32>
    %98 = arith.addf %97, %96 : vector<8x128xf32>
    %99 = arith.mulf %88, %98 : vector<8x128xf32>
    %100 = arith.truncf %99 : vector<8x128xf32> to vector<8x128xbf16>
    %c0_49 = arith.constant 0 : index
    %c0_50 = arith.constant 0 : index
    %101 = vector.load %arg14[%c0_49, %c0_50] : memref<128x32xbf16, #tpu.memory_space<vmem>>, vector<128x32xbf16>
    %cst_51 = arith.constant dense<0.000000e+00> : vector<8x32xf32>
    %102 = tpu.matmul %100, %101, %cst_51 {dimension_numbers = #tpu.dot_dimension_numbers<[1], [0], [0], [1], [0, 0, 1, 1], [], []>} : vector<8x128xbf16>, vector<128x32xbf16>, vector<8x32xf32> -> vector<8x32xf32>
    %103 = arith.addf %56, %102 : vector<8x32xf32>
    %c0_52 = arith.constant 0 : index
    %c0_53 = arith.constant 0 : index
    %104 = vector.load %arg15[%c0_52, %c0_53] : memref<1x32xf32, #tpu.memory_space<vmem>>, vector<1x32xf32>
    %105 = vector.broadcast %104 : vector<1x32xf32> to vector<8x32xf32>
    %106 = arith.addf %103, %105 : vector<8x32xf32>
    %107 = arith.truncf %106 : vector<8x32xf32> to vector<8x32xbf16>
    %c0_54 = arith.constant 0 : index
    %c0_55 = arith.constant 0 : index
    %c0_56 = arith.constant 0 : index
    %108 = vector.load %arg16[%c0_54, %c0_55, %c0_56] : memref<1x8x32xbf16, #tpu.memory_space<vmem>>, vector<1x8x32xbf16>
    %109 = vector.shape_cast %108 : vector<1x8x32xbf16> to vector<8x32xbf16>
    %110 = vector.shape_cast %107 : vector<8x32xbf16> to vector<1x8x32xbf16>
    tpu.vector_store %arg16[%c0_54, %c0_55, %c0_56], %110 {strides = array<i32>} : memref<1x8x32xbf16, #tpu.memory_space<vmem>>, vector<1x8x32xbf16>,
    return
  }
  func.func @transform_0(%arg0: i32, %arg1: i32) -> (i32, i32, i32) {
    %c0_i32 = arith.constant 0 : i32
    %c0_i32_0 = arith.constant 0 : i32
    %c0_i32_1 = arith.constant 0 : i32
    return %arg0, %c0_i32, %c0_i32_0 : i32, i32, i32
  }
  func.func @transform_1(%arg0: i32, %arg1: i32) -> (i32, i32, i32) {
    %c0_i32 = arith.constant 0 : i32
    %c0_i32_0 = arith.constant 0 : i32
    %c0_i32_1 = arith.constant 0 : i32
    return %arg0, %c0_i32, %c0_i32_0 : i32, i32, i32
  }
  func.func @transform_2(%arg0: i32, %arg1: i32) -> (i32, i32) {
    %c0_i32 = arith.constant 0 : i32
    %c0_i32_0 = arith.constant 0 : i32
    %c0_i32_1 = arith.constant 0 : i32
    return %c0_i32, %c0_i32_0 : i32, i32
  }
  func.func @transform_3(%arg0: i32, %arg1: i32) -> (i32, i32) {
    %c0_i32 = arith.constant 0 : i32
    %c0_i32_0 = arith.constant 0 : i32
    %c0_i32_1 = arith.constant 0 : i32
    return %c0_i32, %c0_i32_0 : i32, i32
  }
  func.func @transform_4(%arg0: i32, %arg1: i32) -> (i32, i32) {
    %c0_i32 = arith.constant 0 : i32
    %c0_i32_0 = arith.constant 0 : i32
    %c0_i32_1 = arith.constant 0 : i32
    return %c0_i32, %c0_i32_0 : i32, i32
  }
  func.func @transform_5(%arg0: i32, %arg1: i32) -> (i32, i32) {
    %c0_i32 = arith.constant 0 : i32
    %c0_i32_0 = arith.constant 0 : i32
    %c0_i32_1 = arith.constant 0 : i32
    return %c0_i32, %c0_i32_0 : i32, i32
  }
  func.func @transform_6(%arg0: i32, %arg1: i32) -> (i32, i32) {
    %c0_i32 = arith.constant 0 : i32
    %c0_i32_0 = arith.constant 0 : i32
    %c0_i32_1 = arith.constant 0 : i32
    return %c0_i32, %c0_i32_0 : i32, i32
  }
  func.func @transform_7(%arg0: i32, %arg1: i32) -> (i32, i32) {
    %c0_i32 = arith.constant 0 : i32
    %c0_i32_0 = arith.constant 0 : i32
    %c0_i32_1 = arith.constant 0 : i32
    return %c0_i32, %c0_i32_0 : i32, i32
  }
  func.func @transform_8(%arg0: i32, %arg1: i32) -> (i32, i32) {
    %c0_i32 = arith.constant 0 : i32
    %c0_i32_0 = arith.constant 0 : i32
    %c0_i32_1 = arith.constant 0 : i32
    return %c0_i32, %c0_i32_0 : i32, i32
  }
  func.func @transform_9(%arg0: i32, %arg1: i32) -> (i32, i32) {
    %c0_i32 = arith.constant 0 : i32
    %c0_i32_0 = arith.constant 0 : i32
    %c0_i32_1 = arith.constant 0 : i32
    return %c0_i32, %c0_i32_0 : i32, i32
  }
  func.func @transform_10(%arg0: i32, %arg1: i32) -> (i32, i32) {
    %c0_i32 = arith.constant 0 : i32
    %c0_i32_0 = arith.constant 0 : i32
    %c0_i32_1 = arith.constant 0 : i32
    return %c0_i32, %c0_i32_0 : i32, i32
  }
  func.func @transform_11(%arg0: i32, %arg1: i32) -> (i32, i32) {
    %c0_i32 = arith.constant 0 : i32
    %c0_i32_0 = arith.constant 0 : i32
    %c0_i32_1 = arith.constant 0 : i32
    return %c0_i32, %c0_i32_0 : i32, i32
  }
  func.func @transform_12(%arg0: i32, %arg1: i32) -> (i32, i32) {
    %c0_i32 = arith.constant 0 : i32
    %c0_i32_0 = arith.constant 0 : i32
    %c0_i32_1 = arith.constant 0 : i32
    return %c0_i32, %c0_i32_0 : i32, i32
  }
  func.func @transform_13(%arg0: i32, %arg1: i32) -> (i32, i32) {
    %c0_i32 = arith.constant 0 : i32
    %c0_i32_0 = arith.constant 0 : i32
    %c0_i32_1 = arith.constant 0 : i32
    return %c0_i32, %c0_i32_0 : i32, i32
  }
  func.func @transform_14(%arg0: i32, %arg1: i32) -> (i32, i32, i32) {
    %c0_i32 = arith.constant 0 : i32
    %c0_i32_0 = arith.constant 0 : i32
    return %arg0, %arg1, %c0_i32 : i32, i32, i32
  }
}

</mosaic_0001>

<bundles_post_ra>
// kernel: tpu_custom_call.1
= control target key start
LH: loop header
LB: loop body
LE: loop exit
PB: predicated region body
PF: predicated region fallthrough
CT: control target
= control target key end

     0   :  { %s2297_s0 = inlined_call_operand.vmem [shape: bf16[2,8,32], index: 0, kind: input, shape index: {}]   ;;  %s2298_s1 = inlined_call_operand.vmem [shape: f32[2,1,8], index: 1, kind: input, shape index: {}]   ;;  %s2299_s2 = inlined_call_operand.vmem [shape: f32[1,32], index: 2, kind: input, shape index: {}]   ;;  %s2300_s3 = inlined_call_operand.vmem [shape: f32[1,32], index: 3, kind: input, shape index: {}]   ;;  %s2301_s4 = inlined_call_operand.vmem [shape: bf16[32,96], index: 4, kind: input, shape index: {}]   ;;  %s2302_s5 = inlined_call_operand.vmem [shape: f32[1,96], index: 5, kind: input, shape index: {}]   ;;  %s2303_s6 = inlined_call_operand.vmem [shape: bf16[32,32], index: 6, kind: input, shape index: {}]   ;;  %s2304_s7 = inlined_call_operand.vmem [shape: f32[1,32], index: 7, kind: input, shape index: {}]   ;;  %s2305_s8 = inlined_call_operand.vmem [shape: f32[1,32], index: 8, kind: input, shape index: {}]   ;;  %s2306_s9 = inlined_call_operand.vmem [shape: f32[1,32], index: 9, kind: input, shape index: {}]   ;;  %s2307_s10 = inlined_call_operand.vmem [shape: bf16[32,128], index: 10, kind: input, shape index: {}]   ;;  %s2308_s11 = inlined_call_operand.vmem [shape: f32[1,128], index: 11, kind: input, shape index: {}]   ;;  %s2309_s12 = inlined_call_operand.vmem [shape: bf16[128,32], index: 12, kind: input, shape index: {}]   ;;  %s2310_s13 = inlined_call_operand.vmem [shape: f32[1,32], index: 13, kind: input, shape index: {}]   ;;  %s2311_s14 = inlined_call_operand.hbm [shape: bf16[2,8,32], index: 14, kind: output, shape index: {}]  }
   0x1   :  { %2313 = sst [smem:[#allocation10_spill]] %s2297_s0 }
   0x2   :  { %2314 = sst [smem:[#allocation11_spill]] %s2298_s1 }
   0x3   :  { %2315 = sst [smem:[#allocation12_spill]] %s2299_s2 }
   0x4   :  { %2316 = sst [smem:[#allocation13_spill]] %s2300_s3 }
   0x5   :  { %19 = vsyncpa [#allocation7], 0 }
   0x6   :  { %21 = vsyncpa [#allocation7 + $0x1], 0  ;;  %s2006_s29 = smov 0   ;;  %s2008_s30 = smov 0  }
   0x7   :  { %s2010_s15 = smov 0   ;;  %s2012_s16 = smov 0  }
   0x8   :  { %s2014_s17 = smov 0   ;;  %s2016_s18 = smov 0  }
   0x9 LB: > { %s1545_s19 = sadd.s32 4294967295, %s1911_s18   ;;  %s1546_s20 = sadd.s32 4294967294, %s1911_s18   ;;  %s1911_s18 = sphi %s2016_s18, %s27_s18   ;;  %s1907_s17 = sphi %s2014_s17, %s2329_s17   ;;  %s1903_s16 = sphi %s2012_s16, %s2328_s16   ;;  %s1899_s15 = sphi %s2010_s15, %s2327_s15   ;;  %s1895_s30 = sphi %s2008_s30, %s2326_s30   ;;  %s1891_s29 = sphi %s2006_s29, %s2325_s29  }
   0xa   : > { %s39_s21 = sadd.s32 1, %s1907_s17  ;;  %s352_s22 = sadd.s32 1, %s1899_s15 }
   0xb   : > { %p41_p0 = scmp.ge.s32.totalorder %s39_s21, 2  ;;  %p362_p1 = scmp.ne.s32.totalorder %s1899_s15, %s1895_s30 }
   0xc   : > { %p363_p2 = scmp.eq.s32.totalorder %s1545_s19, 1  ;;  %p368_p3 = scmp.ne.s32.totalorder %s1895_s30, %s1891_s29 }
   0xd   : > { %s2331_s21 = smov (%p41_p0, %s39_s21), 0  ;;  %p369_p5 = scmp.eq.s32.totalorder %s1546_s20, 1 }
   0xe   : > { %2317 = sst [smem:[#allocation9_spill]] %s2331_s21  ;;  %p2046_p4 = por %p363_p2, %p362_p1 }
   0xf   : > { %s347_s24 = ssub.s32 %s1907_s17, %s2331_s21  ;;  %p1549_p6 = scmp.ge.s32.totalorder %s1911_s18, 1 }
  0x10   : > { %p350_p7 = scmp.eq.s32.totalorder %s347_s24, 0  ;;  %p2053_p8 = por %p369_p5, %p368_p3 }
  0x11   : > { %p436_p9 = scmp.lt.s32.totalorder %s1911_s18, 3 }
  0x12   : > { %s2059_s26 = scalar_select %p350_p7, %s1899_s15, %s352_s22  }
  0x13   : > { %p437_p10 = pnand %p1549_p6, %p436_p9 }
  0x14   : > { %p484_p11 = scmp.lt.s32.totalorder (!%p437_p10), %s1903_s16, 1  ;;  %s2320_s0 = sld [smem:[#allocation10_spill]] (!%p437_p10) }
  0x15   : > { %440 = sbr.rel (%p437_p10) target bundleno = 2341 (0x925), region = 76  ;;  %s2321_s2 = sld [smem:[#allocation12_spill]] (!%p437_p10) }
  0x16   : > { %s2322_s3 = sld [smem:[#allocation13_spill]] (!%p437_p10)  ;;  %s1915_s21 = smov (!%p437_p10), 80  }
  0x17   : > { %s1916_s20 = smov (!%p437_p10), 96   ;;  %s1917_s22 = smov (!%p437_p10), 88  }
  0x18   : > { %s1920_s19 = smov (!%p437_p10), 112   ;;  %s2323_s1 = sld [smem:[#allocation11_spill]] (!%p437_p10) }
  0x1a   : > { %s2063_s27 = scalar_select %p484_p11, %s1903_s16, 1  ;;  %vm500_vm0 = vcmask 261120   ;;  %v1795_v8 = vld [vmem:[%s2301_s4 + $0x8] sm:$0xff]   ;;  %v1913_v9 = vmov 0.0   ;;  %vm1914_vm1 = vmmov 0   ;;  %v1796_v10 = vld [vmem:[%s2301_s4] sm:$0xff]   ;;  %v684_v55 = vlaneseq }
  0x1b   : > { %1631 = vmatprep.subr.bf16.mxu0 %v1913_v9  ;;  %1635 = vmatprep.mubr.msk.bf16.mxu0 %vm1914_vm1, %v1913_v9  ;;  %v1552_v19 = vld [vmem:[%s2321_s2] ss:$0 sm:$0xff]  ;;  %vm605_vm4 = vcmask 60416   ;;  %vm689_vm5 = vcmask 64512   ;;  %vm929_vm6 = vcmask 1043456   ;;  %vm1131_vm8 = vcmask 126016  }
  0x1c   : > { %s1551_s28 = sshll.u32 %s2063_s27, 2  ;;  %1632 = vmatpush3.bf16.msra.mxu0 %v1795_v8  ;;  %1651 = vmatprep.subr.bf16.mxu1 %v1913_v9  ;;  %v1553_v22 = vld [vmem:[%s2322_s3] ss:$0 sm:$0xff]  ;;  %v685_v57 = vshrl.u32 %v684_v55, 7  ;;  %v1923_v59 = vmov -1e+09  }
  0x1d   : > { %s2069_s24 = scalar_lea.vmem %s2320_s0, %s1551_s28  ;;  %1633 = vmatprep.subr.bf16.mxu0 %v1913_v9  ;;  %1653 = vmatprep.mubr.msk.bf16.mxu1 %vm1914_vm1, %v1913_v9  ;;  %v1554_v26 = vld [vmem:[%s2302_s5] ss:$0 sm:$0xff]  ;;  %s1918_s0 = smov 120   ;;  %vm1139_vm9 = vcmask 191616   ;;  %vm1147_vm10 = vcmask 257216   ;;  %vm1447_vm13 = vcmask 257024  }
  0x1e   : > { %v496_v0 = vld [vmem:[%s2069_s24] sm:$0xf]  ;;  %s1919_s28 = smov 72   ;;  %v686_v58 = vsub.s32 0, %v685_v57 }
  0x1f   : > { %v497_v1 = vunpack.c.l.bf16 %v496_v0 }
  0x20   : > { %1634 = vmatpush3.bf16.msra.mxu0 %v1796_v10 }
  0x21   : > { %v501_v2 = vsel %vm500_vm0, %v497_v1, 0.0  ;;  %1639 = vmatprep.subr.bf16.mxu0 %v1913_v9 }
  0x22   : > { %502 = vadd.xlane.f32.xlu0 %v501_v2 }
  0xab   : > { %v503_v3 = vpop.xlane.xlu0 %502 }
  0xac   : > { %v505_v4 = vmul.f32 0.03125, %v503_v3 }
  0xae   : > { %v506_v5 = vsub.f32 %v497_v1, %v505_v4 }
  0xb0   : > { %v507_v6 = vmul.f32 %v506_v5, %v506_v5  ;;  %v526_v20 = vmul.f32 %v1552_v19, %v506_v5 }
  0xb2   : > { %v508_v7 = vsel %vm500_vm0, %v507_v6, 0.0 }
  0xb3   : > { %509 = vadd.xlane.f32.xlu0 %v508_v7 }
 0x13c   : > { %v510_v11 = vpop.xlane.xlu0 %509 }
 0x13d   : > { %v512_v12 = vmul.f32 0.032258064, %v510_v11 }
 0x13f   : > { %1809 = vrsqrt.f32 %v512_v12  ;;  %vm515_vm2 = vcmp.eq.f32.partialorder %v512_v12, inf  ;;  %v518_v15 = vand.u32 2147483648, %v512_v12  ;;  %vm517_vm3 = vcmp.eq.f32.partialorder %v512_v12, 0.0 }
 0x14c   : > { %v1810_v13 = vpop.eup %1809 }
 0x14d   : > { %v514_v14 = vmul.f32 %v1810_v13, %v512_v12 }
 0x14f   : > { %v516_v16 = vsel %vm515_vm2, %v512_v12, %v514_v14 }
 0x150   : > { %v519_v17 = vsel %vm517_vm3, %v518_v15, %v516_v16 }
 0x151   : > { %v527_v18 = vadd.f32 1e-06, %v519_v17 }
 0x153   : > { %1811 = vrcp.f32 %v527_v18 }
 0x160   : > { %v1812_v21 = vpop.eup %1811 }
 0x161   : > { %v529_v23 = vmul.f32 %v1812_v21, %v526_v20 }
 0x163   : > { %v536_v24 = vadd.f32 %v1553_v22, %v529_v23 }
 0x165   : > { %v537_v25 = vpack.c.bf16 %v536_v24, %v536_v24 }
 0x167   : > { %1636 = vmatmul.mubr.msk.bf16.vlgmr.msra.gmra.mxu0 %vm500_vm0, %v537_v25 }
 0x168   : > { %1641 = vmatprep.mubr.msk.bf16.mxu0 %vm1914_vm1, %v1913_v9 }
 0x227   : > { %v598_v27 = vpop.f32.mrf.mxu0 }
 0x228   : > { %v599_v28 = vadd.f32 %v1554_v26, %v598_v27 }
 0x229   : > { %v1637_v29 = vpop.f32.mrf.mxu0 }
 0x22a   : > { %v2100_v30 = vpack.c.bf16 %v599_v28, %v599_v28 }
 0x22b   : > { %v601_v31 = vpop.f32.mrf.mxu0 }
 0x22c   : > { %638 = vrot.lane.b32.xlu0 %v2100_v30, %s1915_s21  ;;  %610 = vrot.lane.b32.xlu1 %v2100_v30, %s1916_s20  ;;  %606 = vst.msk [vmem:[#allocation2] sm:$0xf] %vm605_vm4, %v2100_v30  ;;  %s1921_s21 = smov 104   ;;  %s1922_s20 = smov 64  }
 0x22d   : > { %v1638_v32 = vpop.f32.mrf.mxu0 }
 0x230   : > { %623 = vrot.lane.b32.xlu1 %v2100_v30, %s1917_s22 }
 0x233   : > { %v672_v44 = vld [vmem:[#allocation2] sm:$0xf] }
 0x234   : > { %618 = vrot.lane.b32.xlu1 %v2100_v30, %s1918_s0  ;;  %s1927_s0 = smov 16  }
 0x238   : > { %653 = vrot.lane.b32.xlu1 %v2100_v30, %s1919_s28  ;;  %s490_s28 = scalar_lea.vmem %s2323_s1, %s2063_s27  ;;  %s1924_s27 = smov 48  }
 0x239   : > { %v676_v56 = vld [vmem:[%s490_s28] sm:$0x1]  ;;  %s481_s28 = sand.u32 1, %s1895_s30  }
 0x23a   : > { %vm677_vm7 = vcmp.gt.f32.partialorder %v676_v56, 0.0 }
 0x23b   : > { %v678_v60 = vsel %vm677_vm7, 0.0, %v1923_v59 }
 0x23c   : > { %633 = vrot.lane.b32.xlu1 %v2100_v30, %s1920_s19  ;;  %v687_v61 = vrot.slane %v678_v60, %v686_v58  ;;  %s1925_s19 = smov 40  }
 0x240   : > { %648 = vrot.lane.b32.xlu1 %v2100_v30, %s1921_s21  ;;  %s1926_s21 = smov 56  }
 0x244   : > { %614 = vrot.lane.b32.xlu1 %v2100_v30, %s1922_s20  ;;  %s1590_s20 = sshll.u32 %s1903_s16, 6  ;;  %s1930_s16 = smov [#allocation6]  }
 0x245   : > { %s2257_s2 = scalar_lea.hbm %s2311_s14, %s1590_s20 }
 0x29e   : > { %v639_v33 = vpop.permute.xlu0 %638  ;;  %v611_v34 = vpop.permute.xlu1 %610 }
 0x29f   : > { %642 = vst.msk [vmem:[#allocation3 + $0x8] sm:$0xf] %vm605_vm4, %v639_v33  ;;  %613 = vst.msk [vmem:[#allocation3] sm:$0xf] %vm605_vm4, %v611_v34 }
 0x2a2   : > { %v624_v35 = vpop.permute.xlu1 %623 }
 0x2a3   : > { %627 = vst.msk [vmem:[#allocation3 + $0x4] sm:$0xf] %vm605_vm4, %v624_v35 }
 0x2a6   : > { %v619_v36 = vpop.permute.xlu1 %618  ;;  %v679_v37 = vld [vmem:[#allocation3] sm:$0xf]  ;;  %v681_v38 = vld [vmem:[#allocation3 + $0x8] sm:$0xf] }
 0x2a7   : > { %622 = vst.msk [vmem:[#allocation2 + $0x4] sm:$0xf] %vm605_vm4, %v619_v36  ;;  %v694_v39 = vsel %vm689_vm5, %v679_v37, 0  ;;  %v786_v40 = vsel %vm689_vm5, %v681_v38, 0 }
 0x2a8   : > { %1640 = vmatpush3.bf16.xpose.msra.mxu0 %v694_v39  ;;  %1652 = vmatpush3.bf16.xpose.msra.mxu1 %v786_v40 }
 0x2a9   : > { %1645 = vmatprep.subr.bf16.mxu0 %v1913_v9  ;;  %1663 = vmatprep.subr.bf16.mxu1 %v1913_v9 }
 0x2aa   : > { %v654_v41 = vpop.permute.xlu1 %653  ;;  %v680_v42 = vld [vmem:[#allocation3 + $0x4] sm:$0xf] }
 0x2ab   : > { %657 = vst.msk [vmem:[#allocation3 + $0xc] sm:$0xf] %vm605_vm4, %v654_v41  ;;  %v740_v45 = vsel %vm689_vm5, %v680_v42, 0 }
 0x2ae   : > { %v634_v43 = vpop.permute.xlu1 %633  ;;  %v673_v49 = vld [vmem:[#allocation2 + $0x4] sm:$0xf] }
 0x2af   : > { %637 = vst.msk [vmem:[#allocation2 + $0x8] sm:$0xf] %vm605_vm4, %v634_v43  ;;  %1642 = vmatmul.mubr.msk.bf16.vlgmr.msra.gmra.mxu0 %vm689_vm5, %v672_v44 }
 0x2b0   : > { %1646 = vmatpush3.bf16.xpose.msra.mxu0 %v740_v45  ;;  %1647 = vmatprep.mubr.msk.bf16.mxu0 %vm1914_vm1, %v1913_v9 }
 0x2b1   : > { %1657 = vmatprep.subr.bf16.mxu0 %v1913_v9 }
 0x2b2   : > { %v649_v46 = vpop.permute.xlu1 %648  ;;  %v682_v47 = vld [vmem:[#allocation3 + $0xc] sm:$0xf] }
 0x2b3   : > { %652 = vst.msk [vmem:[#allocation2 + $0xc] sm:$0xf] %vm605_vm4, %v649_v46  ;;  %v832_v51 = vsel %vm689_vm5, %v682_v47, 0 }
 0x2b6   : > { %v615_v48 = vpop.permute.xlu1 %614  ;;  %v674_v50 = vld [vmem:[#allocation2 + $0x8] sm:$0xf] }
 0x2b7   : > { %617 = vst.msk [vmem:[#allocation4] sm:$0xf] %vm605_vm4, %v615_v48  ;;  %1648 = vmatmul.mubr.msk.bf16.vlgmr.msra.gmra.mxu0 %vm689_vm5, %v673_v49  ;;  %1654 = vmatmul.mubr.msk.bf16.vlgmr.msra.gmra.mxu1 %vm689_vm5, %v674_v50 }
 0x2b8   : > { %1658 = vmatpush3.bf16.xpose.msra.mxu0 %v832_v51  ;;  %1659 = vmatprep.mubr.msk.bf16.mxu0 %vm1914_vm1, %v1913_v9 }
 0x2b9   : > { %1665 = vmatprep.mubr.msk.bf16.mxu1 %vm1914_vm1, %v1913_v9  ;;  %1669 = vmatprep.subr.bf16.mxu0 %v1913_v9 }
 0x2ba   : > { %v675_v52 = vld [vmem:[#allocation2 + $0xc] sm:$0xf] }
 0x2be   : > { %v922_v53 = vld [vmem:[#allocation4] sm:$0xf] }
 0x2bf   : > { %1660 = vmatmul.mubr.msk.bf16.vlgmr.msra.gmra.mxu0 %vm689_vm5, %v675_v52  ;;  %v931_v54 = vsel %vm929_vm6, %v922_v53, 0 }
 0x2c0   : > { %1664 = vmatpush3.bf16.msra.mxu1 %v931_v54  ;;  %1671 = vmatprep.mubr.msk.bf16.mxu0 %vm1914_vm1, %v1913_v9 }
 0x2c1   : > { %1675 = vmatprep.subr.bf16.mxu1 %v1913_v9 }
 0x36f   : > { %v730_v62 = vpop.f32.mrf.mxu0 }
 0x370   : > { %v731_v63 = vadd.f32 %v730_v62, %v687_v61 }
 0x371   : > { %v1643_v0 = vpop.f32.mrf.mxu0 }
 0x372   : > { %v874_v1 = vsel %vm689_vm5, %v731_v63, -inf }
 0x373   : > { %875 = vmax.xlane.f32.xlu1 %v874_v1  ;;  %v733_v2 = vpop.f32.mrf.mxu0 }
 0x375   : > { %v1644_v3 = vpop.f32.mrf.mxu0 }
 0x377   : > { %v776_v4 = vpop.f32.mrf.mxu0  ;;  %v822_v5 = vpop.f32.mrf.mxu1 }
 0x378   : > { %v777_v6 = vadd.f32 %v776_v4, %v687_v61  ;;  %v823_v7 = vadd.f32 %v822_v5, %v687_v61 }
 0x379   : > { %v1649_v8 = vpop.f32.mrf.mxu0  ;;  %v1655_v10 = vpop.f32.mrf.mxu1 }
 0x37a   : > { %v880_v11 = vsel %vm689_vm5, %v823_v7, -inf  ;;  %v877_v12 = vsel %vm689_vm5, %v777_v6, -inf }
 0x37b   : > { %v825_v13 = vpop.f32.mrf.mxu1  ;;  %881 = vmax.xlane.f32.xlu1 %v880_v11  ;;  %878 = vmax.xlane.f32.xlu0 %v877_v12  ;;  %v779_v14 = vpop.f32.mrf.mxu0 }
 0x37d   : > { %v1650_v15 = vpop.f32.mrf.mxu0  ;;  %v1656_v16 = vpop.f32.mrf.mxu1 }
 0x37e   : > { %v1797_v15 = vld [vmem:[%s2303_s6 + $0x8] sm:$0xff]  }
 0x37f   : > { %v868_v17 = vpop.f32.mrf.mxu0 }
 0x380   : > { %v869_v18 = vadd.f32 %v868_v17, %v687_v61 }
 0x381   : > { %v1661_v19 = vpop.f32.mrf.mxu0 }
 0x382   : > { %v883_v20 = vsel %vm689_vm5, %v869_v18, -inf  ;;  %v1798_v19 = vld [vmem:[%s2303_s6] sm:$0xff]  }
 0x383   : > { %884 = vmax.xlane.f32.xlu0 %v883_v20  ;;  %v871_v21 = vpop.f32.mrf.mxu0 }
 0x385   : > { %v1662_v22 = vpop.f32.mrf.mxu0 }
 0x38c   : > { %643 = vrot.lane.b32.xlu1 %v2100_v30, %s1924_s27  ;;  %s1550_s27 = sshll.u32 %s481_s28, 2 }
 0x38d   : > { %s483_s22 = scalar_lea.vmem [#allocation6], %s1550_s27  ;;  %s1839_s27 = sshll.u32 %s1930_s16, 4  ;;  %s1840_s27 = int_to_ptr.vmem [resolvable:$false] %s1839_s27 }
 0x38e   : > { %s1841_s3 = scalar_lea.vmem %s1840_s27, 128 }
 0x390   : > { %658 = vrot.lane.b32.xlu1 %v2100_v30, %s1925_s19  ;;  %s1928_s19 = smov 8  }
 0x399   : > { %628 = vrot.lane.b32.xlu0 %v2100_v30, %s1926_s21  ;;  %s1929_s21 = smov 24  }
 0x3fc   : > { %v876_v23 = vpop.xlane.xlu1 %875 }
 0x3fd   : > { %v886_v24 = vsub.f32 %v731_v63, %v876_v23 }
 0x3ff   : > { %v890_v25 = vpack.c.bf16 %v886_v24, %v886_v24 }
 0x401   : > { %v895_v26 = vmul.bf16 1069105081, %v890_v25 }
 0x403   : > { %1813 = vpow.bf16 %v895_v26 }
 0x404   : > { %v882_v27 = vpop.xlane.xlu1 %881  ;;  %v879_v28 = vpop.xlane.xlu0 %878 }
 0x405   : > { %v888_v29 = vsub.f32 %v823_v7, %v882_v27  ;;  %v887_v31 = vsub.f32 %v777_v6, %v879_v28 }
 0x407   : > { %v892_v32 = vpack.c.bf16 %v888_v29, %v888_v29  ;;  %v891_v33 = vpack.c.bf16 %v887_v31, %v887_v31 }
 0x408   : > { %v644_v34 = vpop.permute.xlu1 %643 }
 0x409   : > { %v901_v35 = vmul.bf16 1069105081, %v892_v32  ;;  %v898_v36 = vmul.bf16 1069105081, %v891_v33  ;;  %647 = vst.msk [vmem:[#allocation4 + $0x8] sm:$0xf] %vm605_vm4, %v644_v34 }
 0x40b   : > { %1815 = vpow.bf16 %v901_v35 }
 0x40c   : > { %1817 = vpow.bf16 %v898_v36  ;;  %v659_v37 = vpop.permute.xlu1 %658  ;;  %v885_v30 = vpop.xlane.xlu0 %884  ;;  %v668_v36 = vld [vmem:[%s2069_s24] sm:$0xf]  ;;  %s1464_s24 = sshll.u32 %s483_s22, 4  ;;  %s1465_s24 = int_to_ptr.vmem [resolvable:$true] %s1464_s24 }
 0x40d   : > { %662 = vst.msk [vmem:[#allocation4 + $0xc] sm:$0xf] %vm605_vm4, %v659_v37  ;;  %v889_v38 = vsub.f32 %v869_v18, %v885_v30  ;;  %v1570_v37 = vld [vmem:[%s2304_s7] ss:$0 sm:$0xff]  ;;  %v669_v30 = vunpack.c.l.bf16 %v668_v36  ;;  %p1842_p1 = scmp.lt.s32.totalorder %s1465_s24, %s1840_s27 }
 0x40f   : > { %v893_v39 = vpack.c.bf16 %v889_v38, %v889_v38 }
 0x410   : > { %v629_v40 = vpop.permute.xlu0 %628  ;;  %v924_v41 = vld [vmem:[#allocation4 + $0x8] sm:$0xf] }
 0x411   : > { %v1814_v42 = vpop.eup %1813  ;;  %v904_v43 = vmul.bf16 1069105081, %v893_v39  ;;  %632 = vst.msk [vmem:[#allocation4 + $0x4] sm:$0xf] %vm605_vm4, %v629_v40  ;;  %v1023_v44 = vsel %vm929_vm6, %v924_v41, 0 }
 0x412   : > { %1666 = vmatmul.mubr.msk.bf16.vlgmr.msra.gmra.mxu1 %vm689_vm5, %v1814_v42  ;;  %v906_v58 = vunpack.c.l.bf16 %v1814_v42 }
 0x413   : > { %1819 = vpow.bf16 %v904_v43  ;;  %1676 = vmatpush3.bf16.msra.mxu1 %v1023_v44  ;;  %1677 = vmatprep.mubr.msk.bf16.mxu1 %vm1914_vm1, %v1913_v9 }
 0x414   : > { %1687 = vmatprep.subr.bf16.mxu1 %v1913_v9  ;;  %v925_v50 = vld [vmem:[#allocation4 + $0xc] sm:$0xf]  ;;  %v910_v59 = vsel %vm689_vm5, %v906_v58, 0.0 }
 0x415   : > { %v1069_v54 = vsel %vm929_vm6, %v925_v50, 0  ;;  %v1799_v50 = vld [vmem:[%s2307_s10 + $0x8] sm:$0xff]  }
 0x418   : > { %v923_v45 = vld [vmem:[#allocation4 + $0x4] sm:$0xf] }
 0x419   : > { %v1816_v46 = vpop.eup %1815  ;;  %v977_v47 = vsel %vm929_vm6, %v923_v45, 0 }
 0x41a   : > { %v1818_v48 = vpop.eup %1817  ;;  %1670 = vmatpush3.bf16.msra.mxu0 %v977_v47  ;;  %1678 = vmatmul.mubr.msk.bf16.vlgmr.msra.gmra.mxu1 %vm689_vm5, %v1816_v46  ;;  %v908_v49 = vunpack.c.l.bf16 %v1816_v46 }
 0x41b   : > { %v907_v51 = vunpack.c.l.bf16 %v1818_v48  ;;  %1681 = vmatprep.subr.bf16.mxu0 %v1913_v9  ;;  %1691 = vmatprep.mubr.msk.bf16.mxu1 %vm1914_vm1, %v1913_v9 }
 0x41c   : > { %v916_v52 = vsel %vm689_vm5, %v908_v49, 0.0  ;;  %1688 = vmatpush3.bf16.msra.mxu1 %v1797_v15 }
 0x41d   : > { %917 = vadd.xlane.f32.xlu1 %v916_v52  ;;  %v913_v53 = vsel %vm689_vm5, %v907_v51, 0.0  ;;  %1672 = vmatmul.mubr.msk.bf16.vlgmr.msra.gmra.mxu0 %vm689_vm5, %v1818_v48  ;;  %v1800_v51 = vld [vmem:[%s2307_s10] sm:$0xff]  }
 0x41e   : > { %914 = vadd.xlane.f32.xlu0 %v913_v53  ;;  %1682 = vmatpush3.bf16.msra.mxu0 %v1069_v54 }
 0x41f   : > { %1683 = vmatprep.mubr.msk.bf16.mxu0 %vm1914_vm1, %v1913_v9  ;;  %1695 = vmatprep.subr.bf16.mxu0 %v1913_v9 }
 0x420   : > { %1689 = vmatprep.subr.bf16.mxu1 %v1913_v9 }
 0x421   : > { %v1820_v55 = vpop.eup %1819  ;;  %1690 = vmatpush3.bf16.msra.mxu1 %v1798_v19 }
 0x422   : > { %v909_v56 = vunpack.c.l.bf16 %v1820_v55  ;;  %1703 = vmatprep.subr.bf16.mxu1 %v1913_v9 }
 0x424   : > { %v919_v57 = vsel %vm689_vm5, %v909_v56, 0.0 }
 0x425   : > { %920 = vadd.xlane.f32.xlu0 %v919_v57  ;;  %1684 = vmatmul.mubr.msk.bf16.vlgmr.msra.gmra.mxu0 %vm689_vm5, %v1820_v55 }
 0x426   : > { %1699 = vmatprep.mubr.msk.bf16.mxu0 %vm1914_vm1, %v1913_v9  ;;  %1696 = vmatpush3.bf16.msra.mxu0 %v1799_v50 }
 0x427   : > { %1697 = vmatprep.subr.bf16.mxu0 %v1913_v9 }
 0x429   : > { %911 = vadd.xlane.f32.xlu0 %v910_v59 }
 0x42a   : > { %1698 = vmatpush3.bf16.msra.mxu0 %v1800_v51 }
 0x4a6   : > { %v918_v63 = vpop.xlane.xlu1 %917 }
 0x4a7   : > { %v915_v60 = vpop.xlane.xlu0 %914 }
 0x4ae   : > { %v921_v61 = vpop.xlane.xlu0 %920 }
 0x4b2   : > { %v912_v62 = vpop.xlane.xlu0 %911 }
 0x4b3   : > { %1821 = vrcp.f32 %v912_v62 }
 0x4b4   : > { %1823 = vrcp.f32 %v918_v63  ;;  %v1575_v63 = vld [vmem:[%s2306_s9] ss:$0 sm:$0xff] }
 0x4b5   : > { %1825 = vrcp.f32 %v915_v60  ;;  %v1574_v60 = vld [vmem:[%s2305_s8] ss:$0 sm:$0xff] }
 0x4b6   : > { %1827 = vrcp.f32 %v921_v61 }
 0x4c0   : > { %v1822_v0 = vpop.eup %1821 }
 0x4c1   : > { %v1824_v7 = vpop.eup %1823 }
 0x4c2   : > { %v1826_v12 = vpop.eup %1825 }
 0x4c3   : > { %v1828_v24 = vpop.eup %1827 }
 0x4d2   : > { %v967_v1 = vpop.f32.mrf.mxu1 }
 0x4d3   : > { %v1115_v2 = vmul.f32 %v1822_v0, %v967_v1 }
 0x4d4   : > { %v1667_v3 = vpop.f32.mrf.mxu1 }
 0x4d5   : > { %v1119_v4 = vpack.c.bf16 %v1115_v2, %v1115_v2  ;;  %v1801_v3 = vld [vmem:[%s2309_s12 + $0x38] sm:$0xff]  }
 0x4d6   : > { %v970_v5 = vpop.f32.mrf.mxu1 }
 0x4d7   : > { %1124 = vst.msk [vmem:[#allocation5] sm:$0xf] %vm605_vm4, %v1119_v4  ;;  %v1802_v4 = vld [vmem:[%s2309_s12 + $0x30] sm:$0xff]   ;;  %v1803_v5 = vld [vmem:[%s2309_s12 + $0x28] sm:$0xff]  }
 0x4d8   : > { %v1668_v6 = vpop.f32.mrf.mxu1 }
 0x4d9   : > { %v1804_v6 = vld [vmem:[%s2309_s12 + $0x20] sm:$0xff]  }
 0x4da   : > { %v1059_v8 = vpop.f32.mrf.mxu1 }
 0x4db   : > { %v1117_v10 = vmul.f32 %v1824_v7, %v1059_v8  ;;  %v1805_v7 = vld [vmem:[%s2309_s12 + $0x18] sm:$0xff]   ;;  %v1806_v8 = vld [vmem:[%s2309_s12 + $0x10] sm:$0xff]  }
 0x4dc   : > { %v1679_v11 = vpop.f32.mrf.mxu1 }
 0x4dd   : > { %v1595_v13 = vpack.c.bf16 %v1117_v10, %v1117_v10  ;;  %v1013_v14 = vpop.f32.mrf.mxu0  ;;  %v1807_v10 = vld [vmem:[%s2309_s12 + $0x8] sm:$0xff]   ;;  %v1808_v11 = vld [vmem:[%s2309_s12] sm:$0xff]  }
 0x4de   : > { %v1116_v16 = vmul.f32 %v1826_v12, %v1013_v14  ;;  %v1062_v17 = vpop.f32.mrf.mxu1  ;;  %v1576_v12 = vld [vmem:[%s2308_s11] ss:$0 sm:$0xff] }
 0x4df   : > { %1136 = vrot.lane.b32.xlu0 %v1595_v13, %s1927_s0  ;;  %v1673_v18 = vpop.f32.mrf.mxu0 }
 0x4e0   : > { %v1594_v20 = vpack.c.bf16 %v1116_v16, %v1116_v16  ;;  %v1680_v21 = vpop.f32.mrf.mxu1 }
 0x4e1   : > { %v1016_v22 = vpop.f32.mrf.mxu0 }
 0x4e2   : > { %1128 = vrot.lane.b32.xlu1 %v1594_v20, %s1928_s19  ;;  %s1450_s19 = scalar_lea.sflag [#allocation7], %s481_s28 }
 0x4e3   : > { %v1674_v23 = vpop.f32.mrf.mxu0 }
 0x4e5   : > { %v1105_v25 = vpop.f32.mrf.mxu0 }
 0x4e6   : > { %v1118_v26 = vmul.f32 %v1828_v24, %v1105_v25 }
 0x4e7   : > { %v1685_v27 = vpop.f32.mrf.mxu0 }
 0x4e8   : > { %v1596_v28 = vpack.c.bf16 %v1118_v26, %v1118_v26 }
 0x4e9   : > { %v1108_v29 = vpop.f32.mrf.mxu0 }
 0x4ea   : > { %1144 = vrot.lane.b32.xlu1 %v1596_v28, %s1929_s21  ;;  %v1588_v28 = vld [vmem:[%s2310_s13] ss:$0 sm:$0xff]  ;;  %s1835_s21 = scalar_lea.vmem %s1465_s24, 64 }
 0x4eb   : > { %v1686_v31 = vpop.f32.mrf.mxu0  ;;  %p1836_p12 = scmp.ne.s32.totalorder %s1465_s24, %s1835_s21  ;;  %p1843_p2 = scmp.lt.s32.totalorder %s1841_s3, %s1835_s21 }
 0x4ed   : > { %p1837_p13 = pnand %p1836_p12, %p2046_p4  ;;  %p1844_p3 = por %p1843_p2, %p1842_p1 }
 0x4ef   : > { %p1838_p0 = pneg %p1837_p13 }
 0x4f1   : > { %p1845_p5 = pnand %p1844_p3, %p1838_p0 }
 0x551   : > { %v1137_v33 = vpop.permute.xlu0 %1136 }
 0x554   : > { %v1129_v32 = vpop.permute.xlu1 %1128 }
 0x555   : > { %1132 = vst.msk [vmem:[#allocation5] sm:$0xf] %vm1131_vm8, %v1129_v32 }
 0x556   : > { %1140 = vst.msk [vmem:[#allocation5] sm:$0xf] %vm1139_vm9, %v1137_v33 }
 0x55c   : > { %v1145_v34 = vpop.permute.xlu1 %1144 }
 0x55d   : > { %1148 = vst.msk [vmem:[#allocation5] sm:$0xf] %vm1147_vm10, %v1145_v34 }
 0x564   : > { %v1149_v35 = vld [vmem:[#allocation5] sm:$0xf] }
 0x565   : > { %1692 = vmatmul.mubr.msk.bf16.vlgmr.msra.gmra.mxu1 %vm500_vm0, %v1149_v35 }
 0x566   : > { %1719 = vmatprep.mubr.msk.bf16.mxu1 %vm1914_vm1, %v1913_v9  ;;  %1704 = vmatpush3.bf16.msra.mxu1 %v1801_v3 }
 0x567   : > { %1705 = vmatprep.subr.bf16.mxu1 %v1913_v9 }
 0x56a   : > { %1706 = vmatpush3.bf16.msra.mxu1 %v1802_v4 }
 0x56b   : > { %1707 = vmatprep.subr.bf16.mxu1 %v1913_v9 }
 0x56e   : > { %1708 = vmatpush3.bf16.msra.mxu1 %v1803_v5 }
 0x56f   : > { %1709 = vmatprep.subr.bf16.mxu1 %v1913_v9 }
 0x572   : > { %1710 = vmatpush3.bf16.msra.mxu1 %v1804_v6 }
 0x573   : > { %1711 = vmatprep.subr.bf16.mxu1 %v1913_v9 }
 0x576   : > { %1712 = vmatpush3.bf16.msra.mxu1 %v1805_v7 }
 0x577   : > { %1713 = vmatprep.subr.bf16.mxu1 %v1913_v9 }
 0x57a   : > { %1714 = vmatpush3.bf16.msra.mxu1 %v1806_v8 }
 0x57b   : > { %1715 = vmatprep.subr.bf16.mxu1 %v1913_v9 }
 0x57e   : > { %1716 = vmatpush3.bf16.msra.mxu1 %v1807_v10 }
 0x57f   : > { %1717 = vmatprep.subr.bf16.mxu1 %v1913_v9 }
 0x582   : > { %1718 = vmatpush3.bf16.msra.mxu1 %v1808_v11 }
 0x625   : > { %v1211_v38 = vpop.f32.mrf.mxu1 }
 0x626   : > { %v1212_v39 = vadd.f32 %v1570_v37, %v1211_v38 }
 0x627   : > { %v1693_v40 = vpop.f32.mrf.mxu1 }
 0x628   : > { %v2194_v41 = vadd.f32 %v1212_v39, %v669_v30 }
 0x629   : > { %v1214_v42 = vpop.f32.mrf.mxu1 }
 0x62a   : > { %v1220_v43 = vsel %vm500_vm0, %v2194_v41, 0.0 }
 0x62b   : > { %1221 = vadd.xlane.f32.xlu1 %v1220_v43  ;;  %v1694_v44 = vpop.f32.mrf.mxu1 }
 0x6b4   : > { %v1222_v45 = vpop.xlane.xlu1 %1221 }
 0x6b5   : > { %v1224_v46 = vmul.f32 0.03125, %v1222_v45 }
 0x6b7   : > { %v1225_v47 = vsub.f32 %v2194_v41, %v1224_v46 }
 0x6b9   : > { %v1226_v48 = vmul.f32 %v1225_v47, %v1225_v47  ;;  %v1245_v61 = vmul.f32 %v1574_v60, %v1225_v47 }
 0x6bb   : > { %v1227_v49 = vsel %vm500_vm0, %v1226_v48, 0.0 }
 0x6bc   : > { %1228 = vadd.xlane.f32.xlu0 %v1227_v49 }
 0x745   : > { %v1229_v52 = vpop.xlane.xlu0 %1228 }
 0x746   : > { %v1231_v53 = vmul.f32 0.032258064, %v1229_v52 }
 0x748   : > { %1829 = vrsqrt.f32 %v1231_v53  ;;  %vm1234_vm11 = vcmp.eq.f32.partialorder %v1231_v53, inf  ;;  %v1237_v56 = vand.u32 2147483648, %v1231_v53  ;;  %vm1236_vm12 = vcmp.eq.f32.partialorder %v1231_v53, 0.0 }
 0x755   : > { %v1830_v54 = vpop.eup %1829 }
 0x756   : > { %v1233_v55 = vmul.f32 %v1830_v54, %v1231_v53 }
 0x758   : > { %v1235_v57 = vsel %vm1234_vm11, %v1231_v53, %v1233_v55 }
 0x759   : > { %v1238_v58 = vsel %vm1236_vm12, %v1237_v56, %v1235_v57 }
 0x75a   : > { %v1246_v59 = vadd.f32 1e-06, %v1238_v58 }
 0x75c   : > { %1831 = vrcp.f32 %v1246_v59 }
 0x769   : > { %v1832_v62 = vpop.eup %1831 }
 0x76a   : > { %v1248_v0 = vmul.f32 %v1832_v62, %v1245_v61 }
 0x76c   : > { %v1255_v1 = vadd.f32 %v1575_v63, %v1248_v0 }
 0x76e   : > { %v1256_v2 = vpack.c.bf16 %v1255_v1, %v1255_v1 }
 0x770   : > { %1700 = vmatmul.mubr.msk.bf16.vlgmr.msra.gmra.mxu0 %vm500_vm0, %v1256_v2 }
 0x830   : > { %v1317_v13 = vpop.f32.mrf.mxu0 }
 0x831   : > { %v1318_v14 = vadd.f32 %v1576_v12, %v1317_v13 }
 0x832   : > { %v1701_v15 = vpop.f32.mrf.mxu0 }
 0x833   : > { %v1324_v16 = vmul.f32 %v1318_v14, %v1318_v14  ;;  %v1323_v9 = vmul.f32 0.5, %v1318_v14 }
 0x834   : > { %v1320_v17 = vpop.f32.mrf.mxu0 }
 0x835   : > { %v1325_v18 = vmul.f32 %v1324_v16, %v1318_v14 }
 0x836   : > { %v1702_v19 = vpop.f32.mrf.mxu0 }
 0x837   : > { %v1326_v20 = vmul.f32 0.044715, %v1325_v18 }
 0x839   : > { %v1327_v21 = vadd.f32 %v1326_v20, %v1318_v14 }
 0x83b   : > { %v1328_v22 = vmul.f32 0.7978846, %v1327_v21 }
 0x83d   : > { %1833 = vtanh.f32 %v1328_v22 }
 0x84a   : > { %v1834_v23 = vpop.eup %1833 }
 0x84b   : > { %v1330_v24 = vadd.f32 1.0, %v1834_v23 }
 0x84d   : > { %v1331_v25 = vmul.f32 %v1330_v24, %v1323_v9 }
 0x84f   : > { %v1332_v26 = vpack.c.bf16 %v1331_v25, %v1331_v25 }
 0x851   : > { %1720 = vmatmul.mubr.bf16.vlgmr.msra.gmra.mxu1 %v1332_v26 }
 0x911   : > { %v1431_v27 = vpop.f32.mrf.mxu1 }
 0x912   : > { %v1437_v29 = vadd.f32 %v1431_v27, %v2194_v41 }
 0x913   : > { %v1721_v31 = vpop.f32.mrf.mxu1 }
 0x914   : > { %v1445_v32 = vadd.f32 %v1588_v28, %v1437_v29 }
 0x915   : > { %v1434_v33 = vpop.f32.mrf.mxu1 }
 0x916   : > { %v1446_v34 = vpack.c.bf16 %v1445_v32, %v1445_v32 }
 0x917   : > { %v1722_v35 = vpop.f32.mrf.mxu1 }
 0x918   : > { %1448 = vst.msk [vmem:[%s483_s22] sm:$0xf] %vm1447_vm13, %v1446_v34 }
 0x919   : > { %1848 = shalt.err (!%p1845_p5)
}
 0x91a   : > { %s1849_s1 = scalar_lea.hbm %s2257_s2, 64  ;;  %s1853_s22 = scalar_lea.hbm %s2311_s14, 128 }
 0x91b   : > { %p1850_p6 = scmp.ne.s32.totalorder %s2257_s2, %s1849_s1  ;;  %p1854_p10 = scmp.lt.s32.totalorder %s2257_s2, %s2311_s14 }
 0x91c   : > { %p1855_p11 = scmp.lt.s32.totalorder %s1853_s22, %s1849_s1 }
 0x91d   : > { %p1851_p7 = pnand %p1850_p6, %p2046_p4 }
 0x91e   : > { %p1856_p12 = por %p1855_p11, %p1854_p10 }
 0x91f   : > { %p1852_p9 = pneg %p1851_p7 }
 0x921   : > { %p1857_p13 = pnand %p1856_p12, %p1852_p9 }
 0x923   : > { %1860 = shalt.err (!%p1857_p13)
}
 0x924   : > { %1723 = dma.vmem_to_hbm [thread:$0]  (%p2046_p4), %s1465_s24, 64, %s2257_s2, %s1450_s19  }
 0x925 PF: > { %p1729_p0 = scmp.ge.s32.totalorder %s1911_s18, 2  ;;  %s1476_s3 = sand.u32 1, %s1891_s29  }
 0x926   : > { %s1477_s21 = scalar_lea.sflag [#allocation7], %s1476_s3 }
 0x927   : > { %p1726_p1 = pnand %p1729_p0, %p2053_p8 }
 0x929   : > { %p1727_p2 = pneg %p1726_p1 }
 0x92b   : > { %1886 = dma.done.wait (%p1727_p2), %s1477_s21, 64  }
 0x92c   : > { %1888 = vsyncadd (%p1727_p2), %s1477_s21, 4294967232  ;;  %s27_s18 = sadd.s32 1, %s1911_s18   ;;  %s2324_s2 = sld [smem:[#allocation9_spill]] }
 0x92d   : > { %p24_p3 = scmp.ge.s32.totalorder %s27_s18, 4   ;;  %s2325_s29 = smov %s1895_s30 }
 0x92e   : > { %s2326_s30 = smov %s1899_s15  ;;  %s2327_s15 = smov %s2059_s26 }
 0x92f   : > { %s2328_s16 = smov %s1907_s17  ;;  %26 = sbr.rel (!%p24_p3) target bundleno = 9 (0x9), region = 129 }
 0x932   : > { %s2329_s17 = smov %s2324_s2 }
 0x934   :  { %1482 = vsyncpa [#allocation7], 1 }
 0x935   :  { %1484 = vsyncpa [#allocation7 + $0x1], 1 }

</bundles_post_ra>
